<compile_context>
chip_gen: v5e
topology: v5e:2x2
jax: 0.10.0
libtpu: 0.0.40
codegen_flags: <defaults>
</compile_context>

<pallas_src>
import functools

import jax
import jax.numpy as jnp
from jax.experimental import pallas as pl
from jax.experimental.pallas import tpu as pltpu


def _layernorm(x, gamma, beta, eps=1e-5):
    mu = jnp.mean(x, axis=-1, keepdims=True)
    var = jnp.mean(jnp.square(x - mu), axis=-1, keepdims=True)
    return (x - mu) * jax.lax.rsqrt(var + eps) * gamma + beta


def _gelu(x):
    # Exact (erf-based) GELU, matching torch.nn.GELU() default.
    # (If VALU-bound on v5e, a tanh approximation would move work to the EUP,
    #  but exact torch parity is kept here.)
    return 0.5 * x * (1.0 + jax.lax.erf(x * 0.7071067811865476))


def _row_chunk(rows, target=512):
    """Largest row-chunk <= target that divides `rows` (rows is a mult. of 8)."""
    if rows <= target:
        return rows
    c = target - (target % 8)
    while c >= 8:
        if rows % c == 0:
            return c
        c -= 8
    return rows


def mixer_block_kernel(tokens, batches_per_block, chunk,
                       x_ref,
                       g1_ref, b1_ref,
                       wt1_ref, bt1_ref, wt2_ref, bt2_ref,
                       g2_ref, b2_ref,
                       wc1_ref, bc1_ref, wc2_ref, bc2_ref,
                       o_ref, tok_ref):
    T, bb = tokens, batches_per_block
    rows = bb * T
    n_chunks = rows // chunk
    H = x_ref.shape[1]
    cdt = jnp.bfloat16                      # MXU operand dtype; accumulation stays f32

    # Small params, read once (hoisted out of all loops).
    g1, b1 = g1_ref[...], b1_ref[...]
    g2, b2 = g2_ref[...], b2_ref[...]
    wt1, wt2 = wt1_ref[...], wt2_ref[...]   # bf16 (J, T), (T, J)
    wc1, wc2 = wc1_ref[...], wc2_ref[...]   # bf16 (H, CH), (CH, H)
    bc1, bc2 = bc1_ref[...], bc2_ref[...]   # f32 (1, CH), (1, H)
    J = wt1.shape[0]

    # Hoist token-mix bias broadcasts (JAX does not CSE broadcast_in_dim).
    bt1_b = jnp.broadcast_to(bt1_ref[...], (J, H))
    bt2_b = jnp.broadcast_to(bt2_ref[...], (T, H))

    # ---- token-mixing branch: LN over H, mix along T (per-batch matmuls) ----
    def token_step(lo):
        xb = x_ref[pl.ds(lo, T), :].astype(jnp.float32)                  # (T, H)
        ln1_b = _layernorm(xb, g1, b1)
        a = jnp.dot(wt1, ln1_b.astype(cdt),
                    preferred_element_type=jnp.float32) + bt1_b          # (J, H)
        a = _gelu(a)
        y = jnp.dot(wt2, a.astype(cdt),
                    preferred_element_type=jnp.float32) + bt2_b          # (T, H)
        # Fused first residual: tok_ref holds u = x + token_mix(ln1(x)).
        tok_ref[pl.ds(lo, T), :] = xb + y

    if bb <= 8:                             # short static trip count: unrolled
        for b in range(bb):
            token_step(b * T)
    else:
        @pl.loop(0, bb)
        def _(b):
            token_step(pl.multiple_of(b * T, T))

    # ---- channel-mixing branch: chunked over rows to bound the (chunk, CH)
    #      f32 intermediate; writes straight into o_ref per chunk. ----
    def channel_step(lo):
        u = tok_ref[pl.ds(lo, chunk), :]                                 # (chunk, H)
        ln2 = _layernorm(u, g2, b2)
        z = jnp.dot(ln2.astype(cdt), wc1,
                    preferred_element_type=jnp.float32) + bc1            # (chunk, CH)
        z = _gelu(z)
        z = jnp.dot(z.astype(cdt), wc2,
                    preferred_element_type=jnp.float32) + bc2            # (chunk, H)
        xo = x_ref[pl.ds(lo, chunk), :].astype(jnp.float32)
        # Final residual adds the ORIGINAL x, exactly as in the PyTorch forward
        # (out = channel_mix(ln_channel(x + token_out)) + x).
        o_ref[pl.ds(lo, chunk), :] = (z + xo).astype(o_ref.dtype)

    if n_chunks <= 4:
        for c in range(n_chunks):
            channel_step(c * chunk)
    else:
        @pl.loop(0, n_chunks)
        def _(c):
            channel_step(pl.multiple_of(c * chunk, chunk))


def mixer_block(x, params):
    """MixerBlock forward.  x: (B, T, H); T multiple of 8, H multiple of 128."""
    B, T, H = x.shape
    assert H % 128 == 0, "hidden_dim must be a multiple of 128 (lane-dense layout)"
    assert T % 8 == 0, "num_tokens must be a multiple of 8 (sublane alignment)"
    wc1 = params[8]
    CH = wc1.shape[1]
    x_bytes = jnp.dtype(x.dtype).itemsize

    # --- VMEM-budget-driven tiling (instead of a hard-coded block count) ---
    try:
        info = pltpu.get_tpu_info()
        vmem_cap = int(getattr(info, "vmem_capacity_bytes", 64 << 20))
    except Exception:
        vmem_cap = 64 << 20                                # v7x per-TC: worst case
    vmem_limit = int(min(vmem_cap * 3 // 4, 96 << 20))
    weight_bytes = sum(int(p.size) * jnp.dtype(p.dtype).itemsize for p in params)
    budget = vmem_limit // 2 - 2 * weight_bytes            # target live slab bytes

    def per_block_bytes(rows):
        ck = _row_chunk(rows)
        io = 4 * rows * H * x_bytes        # double-buffered input + output blocks
        scratch = rows * H * 4             # tok_ref scratch (f32)
        interm = ck * (CH + 4 * H) * 4     # bound on per-chunk f32 temporaries
        return io + scratch + interm

    # >=2 blocks so both v7x TensorCores get work; >=4 (when possible) so the
    # single-TC chips (v5e/v6e) have DMA/compute overlap across grid steps.
    min_blocks = 1 if B == 1 else (2 if B < 4 else 4)
    num_blocks = None
    for d in range(1, B + 1):
        if B % d or d < min_blocks:
            continue
        if per_block_bytes((B // d) * T) <= budget:
            num_blocks = d
            break
    if num_blocks is None:
        num_blocks = B                     # fall back to one batch per block
    bb = B // num_blocks
    rows = bb * T
    chunk = _row_chunk(rows)

    # Lane-dense 2-D view: fold (B, T) into rows so the last (lane) dim is H.
    x2 = x.reshape(B * T, H)

    kernel = functools.partial(mixer_block_kernel, T, bb, chunk)
    # Weights / norm params are tiny: load each one whole, same block every step.
    param_specs = [pl.BlockSpec(p.shape, lambda i: (0, 0)) for p in params]

    # NOTE(perf): on v7x the "parallel" axis should shard across the two
    # TensorCores; if profiling shows it does not, switch to CORE_PARALLEL.
    out2 = pl.pallas_call(
        kernel,
        out_shape=jax.ShapeDtypeStruct((B * T, H), x.dtype),
        grid=(num_blocks,),
        in_specs=[pl.BlockSpec((rows, H), lambda i: (i, 0))] + param_specs,
        out_specs=pl.BlockSpec((rows, H), lambda i: (i, 0)),
        scratch_shapes=[pltpu.VMEM((rows, H), jnp.float32)],   # u = x + token_mix slab
        compiler_params=pltpu.CompilerParams(
            dimension_semantics=("parallel",),
            vmem_limit_bytes=vmem_limit),
    )(x2, *params)
    return out2.reshape(B, T, H)


def reference(x, params, mm_dtype=jnp.float32):
    """Pure-JAX reference mirroring the PyTorch forward literally.

    `mm_dtype=jnp.bfloat16` applies the same operand rounding the kernel uses
    (f32 accumulation either way), so the kernel can be checked tightly.
    """
    (g1, b1, wt1, bt1, wt2, bt2, g2, b2, wc1, bc1, wc2, bc2) = params
    f = lambda p: p.astype(jnp.float32)

    def mm(a, w):
        return jnp.matmul(a.astype(mm_dtype), w.astype(mm_dtype),
                          preferred_element_type=jnp.float32)

    ln1 = _layernorm(x.astype(jnp.float32), f(g1), f(b1))
    y = jnp.swapaxes(ln1, 1, 2)                        # (B, H, T)
    y = mm(y, jnp.transpose(wt1)) + f(bt1).T           # (B, H, J)
    y = _gelu(y)
    y = mm(y, jnp.transpose(wt2)) + f(bt2).T           # (B, H, T)
    y = jnp.swapaxes(y, 1, 2)                          # (B, T, H)
    u = x + y
    ln2 = _layernorm(u, f(g2), f(b2))
    z = mm(ln2, wc1) + f(bc1)
    z = _gelu(z)
    z = mm(z, wc2) + f(bc2)
    return z + x                                       # original x, as in the module


if __name__ == "__main__":
    key = jax.random.PRNGKey(0)
    # Small but TPU-friendly shapes: H lane-dense (multiple of 128), T a sublane
    # multiple (8); the batch is tiled into VMEM-budgeted grid blocks.
    B, T, H = 8, 8, 128           # batch, num_tokens, hidden_dim
    TOK_MLP, CH_MLP = 32, 256     # tokens_mlp_dim, channels_mlp_dim

    ks = jax.random.split(key, 13)
    x = jax.random.normal(ks[0], (B, T, H), jnp.float32)

    # LayerNorm params (kept 2-D (1, H) for clean TPU layout / broadcasting), f32.
    g1 = 1.0 + 0.1 * jax.random.normal(ks[1], (1, H), jnp.float32)
    b1 = 0.1 * jax.random.normal(ks[2], (1, H), jnp.float32)
    g2 = 1.0 + 0.1 * jax.random.normal(ks[3], (1, H), jnp.float32)
    b2 = 0.1 * jax.random.normal(ks[4], (1, H), jnp.float32)

    # token_mix: Linear(T -> TOK_MLP), GELU, Linear(TOK_MLP -> T)
    # weights stored bf16 (halves DMA/VMEM), biases f32 column vectors (out, 1).
    wt1 = (0.1 * jax.random.normal(ks[5], (TOK_MLP, T), jnp.float32)).astype(jnp.bfloat16)
    bt1 = 0.1 * jax.random.normal(ks[6], (TOK_MLP, 1), jnp.float32)
    wt2 = (0.1 * jax.random.normal(ks[7], (T, TOK_MLP), jnp.float32)).astype(jnp.bfloat16)
    bt2 = 0.1 * jax.random.normal(ks[8], (T, 1), jnp.float32)

    # channel_mix: Linear(H -> CH_MLP), GELU, Linear(CH_MLP -> H)
    # weights stored bf16 as (in, out) for right-multiplication; biases f32 (1, out).
    wc1 = (0.1 * jax.random.normal(ks[9], (H, CH_MLP), jnp.float32)).astype(jnp.bfloat16)
    bc1 = 0.1 * jax.random.normal(ks[10], (1, CH_MLP), jnp.float32)
    wc2 = (0.1 * jax.random.normal(ks[11], (CH_MLP, H), jnp.float32)).astype(jnp.bfloat16)
    bc2 = 0.1 * jax.random.normal(ks[12], (1, H), jnp.float32)

    params = (g1, b1, wt1, bt1, wt2, bt2, g2, b2, wc1, bc1, wc2, bc2)

    out = jax.block_until_ready(mixer_block(x, params))
    assert out.shape == (B, T, H)

    # Tight check against a reference with the SAME bf16 operand rounding
    # (deliberate tolerance choice for the bf16-MXU path).
    ref_bf16 = reference(x, params, mm_dtype=jnp.bfloat16)
    err_bf16 = jnp.max(jnp.abs(out - ref_bf16))
    assert jnp.allclose(out, ref_bf16, rtol=2e-3, atol=2e-3), f"max abs err {err_bf16}"

    # Loose structural sanity check against f32-activation matmuls.
    ref_f32 = reference(x, params, mm_dtype=jnp.float32)
    err_f32 = jnp.max(jnp.abs(out - ref_f32))
    assert jnp.allclose(out, ref_f32, rtol=1e-1, atol=1e-1), f"max abs err {err_f32}"

    print("KERNEL_OK")
</pallas_src>

<mosaic_0001>
module attributes {stable_mosaic.version = 11 : i64} {
  func.func @mixer_block_kernel(%arg0: i32, %arg1: memref<16x128xf32, #tpu.memory_space<vmem>>, %arg2: memref<1x128xf32, #tpu.memory_space<vmem>>, %arg3: memref<1x128xf32, #tpu.memory_space<vmem>>, %arg4: memref<32x8xbf16, #tpu.memory_space<vmem>>, %arg5: memref<32x1xf32, #tpu.memory_space<vmem>>, %arg6: memref<8x32xbf16, #tpu.memory_space<vmem>>, %arg7: memref<8x1xf32, #tpu.memory_space<vmem>>, %arg8: memref<1x128xf32, #tpu.memory_space<vmem>>, %arg9: memref<1x128xf32, #tpu.memory_space<vmem>>, %arg10: memref<128x256xbf16, #tpu.memory_space<vmem>>, %arg11: memref<1x256xf32, #tpu.memory_space<vmem>>, %arg12: memref<256x128xbf16, #tpu.memory_space<vmem>>, %arg13: memref<1x128xf32, #tpu.memory_space<vmem>>, %arg14: memref<16x128xf32, #tpu.memory_space<vmem>>, %arg15: memref<16x128xf32, #tpu.memory_space<vmem>>) attributes {dimension_semantics = [#tpu.dimension_semantics<parallel>], iteration_bounds = array<i64: 4>, scalar_prefetch = 0 : i64, scratch_operands = 1 : i64, tpu.core_type = #tpu.core_type<tc>, window_params = [{transform_indices = @transform_0, window_bounds = array<i64: 16, 128>}, {pipeline_mode = #tpu.pipeline_mode<synchronous>, transform_indices = @transform_1, window_bounds = array<i64: 1, 128>}, {pipeline_mode = #tpu.pipeline_mode<synchronous>, transform_indices = @transform_2, window_bounds = array<i64: 1, 128>}, {pipeline_mode = #tpu.pipeline_mode<synchronous>, transform_indices = @transform_3, window_bounds = array<i64: 32, 8>}, {pipeline_mode = #tpu.pipeline_mode<synchronous>, transform_indices = @transform_4, window_bounds = array<i64: 32, 1>}, {pipeline_mode = #tpu.pipeline_mode<synchronous>, transform_indices = @transform_5, window_bounds = array<i64: 8, 32>}, {pipeline_mode = #tpu.pipeline_mode<synchronous>, transform_indices = @transform_6, window_bounds = array<i64: 8, 1>}, {pipeline_mode = #tpu.pipeline_mode<synchronous>, transform_indices = @transform_7, window_bounds = array<i64: 1, 128>}, {pipeline_mode = #tpu.pipeline_mode<synchronous>, transform_indices = @transform_8, window_bounds = array<i64: 1, 128>}, {pipeline_mode = #tpu.pipeline_mode<synchronous>, transform_indices = @transform_9, window_bounds = array<i64: 128, 256>}, {pipeline_mode = #tpu.pipeline_mode<synchronous>, transform_indices = @transform_10, window_bounds = array<i64: 1, 256>}, {pipeline_mode = #tpu.pipeline_mode<synchronous>, transform_indices = @transform_11, window_bounds = array<i64: 256, 128>}, {pipeline_mode = #tpu.pipeline_mode<synchronous>, transform_indices = @transform_12, window_bounds = array<i64: 1, 128>}, {transform_indices = @transform_13, window_bounds = array<i64: 16, 128>}]} {
    %c0 = arith.constant 0 : index
    %c0_0 = arith.constant 0 : index
    %0 = vector.load %arg2[%c0, %c0_0] : memref<1x128xf32, #tpu.memory_space<vmem>>, vector<1x128xf32>
    %c0_1 = arith.constant 0 : index
    %c0_2 = arith.constant 0 : index
    %1 = vector.load %arg3[%c0_1, %c0_2] : memref<1x128xf32, #tpu.memory_space<vmem>>, vector<1x128xf32>
    %c0_3 = arith.constant 0 : index
    %c0_4 = arith.constant 0 : index
    %2 = vector.load %arg8[%c0_3, %c0_4] : memref<1x128xf32, #tpu.memory_space<vmem>>, vector<1x128xf32>
    %c0_5 = arith.constant 0 : index
    %c0_6 = arith.constant 0 : index
    %3 = vector.load %arg9[%c0_5, %c0_6] : memref<1x128xf32, #tpu.memory_space<vmem>>, vector<1x128xf32>
    %c0_7 = arith.constant 0 : index
    %c0_8 = arith.constant 0 : index
    %4 = vector.load %arg4[%c0_7, %c0_8] : memref<32x8xbf16, #tpu.memory_space<vmem>>, vector<32x8xbf16>
    %c0_9 = arith.constant 0 : index
    %c0_10 = arith.constant 0 : index
    %5 = vector.load %arg6[%c0_9, %c0_10] : memref<8x32xbf16, #tpu.memory_space<vmem>>, vector<8x32xbf16>
    %c0_11 = arith.constant 0 : index
    %c0_12 = arith.constant 0 : index
    %6 = vector.load %arg10[%c0_11, %c0_12] : memref<128x256xbf16, #tpu.memory_space<vmem>>, vector<128x256xbf16>
    %c0_13 = arith.constant 0 : index
    %c0_14 = arith.constant 0 : index
    %7 = vector.load %arg12[%c0_13, %c0_14] : memref<256x128xbf16, #tpu.memory_space<vmem>>, vector<256x128xbf16>
    %c0_15 = arith.constant 0 : index
    %c0_16 = arith.constant 0 : index
    %8 = vector.load %arg11[%c0_15, %c0_16] : memref<1x256xf32, #tpu.memory_space<vmem>>, vector<1x256xf32>
    %c0_17 = arith.constant 0 : index
    %c0_18 = arith.constant 0 : index
    %9 = vector.load %arg13[%c0_17, %c0_18] : memref<1x128xf32, #tpu.memory_space<vmem>>, vector<1x128xf32>
    %c0_19 = arith.constant 0 : index
    %c0_20 = arith.constant 0 : index
    %10 = vector.load %arg5[%c0_19, %c0_20] : memref<32x1xf32, #tpu.memory_space<vmem>>, vector<32x1xf32>
    %11 = vector.shape_cast %10 : vector<32x1xf32> to vector<32x1xf32>
    %12 = vector.broadcast %11 : vector<32x1xf32> to vector<32x128xf32>
    %c0_21 = arith.constant 0 : index
    %c0_22 = arith.constant 0 : index
    %13 = vector.load %arg7[%c0_21, %c0_22] : memref<8x1xf32, #tpu.memory_space<vmem>>, vector<8x1xf32>
    %14 = vector.shape_cast %13 : vector<8x1xf32> to vector<8x1xf32>
    %15 = vector.broadcast %14 : vector<8x1xf32> to vector<8x128xf32>
    %c0_23 = arith.constant 0 : index
    %c0_24 = arith.constant 0 : index
    %16 = vector.load %arg1[%c0_23, %c0_24] : memref<16x128xf32, #tpu.memory_space<vmem>>, vector<8x128xf32>
    %cst = arith.constant dense<0.000000e+00> : vector<8xf32>
    %17 = vector.multi_reduction <add>, %16, %cst [1] : vector<8x128xf32> to vector<8xf32>
    %18 = vector.shape_cast %17 : vector<8xf32> to vector<8x1xf32>
    %cst_25 = arith.constant 1.280000e+02 : f32
    %19 = vector.broadcast %cst_25 : f32 to vector<8x1xf32>
    %20 = arith.divf %18, %19 : vector<8x1xf32>
    %21 = vector.broadcast %20 : vector<8x1xf32> to vector<8x128xf32>
    %22 = arith.subf %16, %21 : vector<8x128xf32>
    %23 = arith.mulf %22, %22 : vector<8x128xf32>
    %cst_26 = arith.constant dense<0.000000e+00> : vector<8xf32>
    %24 = vector.multi_reduction <add>, %23, %cst_26 [1] : vector<8x128xf32> to vector<8xf32>
    %25 = vector.shape_cast %24 : vector<8xf32> to vector<8x1xf32>
    %cst_27 = arith.constant 1.280000e+02 : f32
    %26 = vector.broadcast %cst_27 : f32 to vector<8x1xf32>
    %27 = arith.divf %25, %26 : vector<8x1xf32>
    %28 = vector.broadcast %20 : vector<8x1xf32> to vector<8x128xf32>
    %29 = arith.subf %16, %28 : vector<8x128xf32>
    %cst_28 = arith.constant 9.99999974E-6 : f32
    %30 = vector.broadcast %cst_28 : f32 to vector<8x1xf32>
    %31 = arith.addf %27, %30 : vector<8x1xf32>
    %32 = math.rsqrt %31 : vector<8x1xf32>
    %33 = vector.broadcast %32 : vector<8x1xf32> to vector<8x128xf32>
    %34 = arith.mulf %29, %33 : vector<8x128xf32>
    %35 = vector.broadcast %0 : vector<1x128xf32> to vector<8x128xf32>
    %36 = arith.mulf %34, %35 : vector<8x128xf32>
    %37 = vector.broadcast %1 : vector<1x128xf32> to vector<8x128xf32>
    %38 = arith.addf %36, %37 : vector<8x128xf32>
    %39 = arith.truncf %38 : vector<8x128xf32> to vector<8x128xbf16>
    %cst_29 = arith.constant dense<0.000000e+00> : vector<32x128xf32>
    %40 = tpu.matmul %4, %39, %cst_29 {dimension_numbers = #tpu.dot_dimension_numbers<[1], [0], [0], [1], [0, 0, 1, 1], [], []>} : vector<32x8xbf16>, vector<8x128xbf16>, vector<32x128xf32> -> vector<32x128xf32>
    %41 = arith.addf %40, %12 : vector<32x128xf32>
    %cst_30 = arith.constant 5.000000e-01 : f32
    %42 = vector.broadcast %cst_30 : f32 to vector<32x128xf32>
    %43 = arith.mulf %42, %41 : vector<32x128xf32>
    %cst_31 = arith.constant 0.707106769 : f32
    %44 = vector.broadcast %cst_31 : f32 to vector<32x128xf32>
    %45 = arith.mulf %41, %44 : vector<32x128xf32>
    %46 = math.erf %45 : vector<32x128xf32>
    %cst_32 = arith.constant 1.000000e+00 : f32
    %47 = vector.broadcast %cst_32 : f32 to vector<32x128xf32>
    %48 = arith.addf %47, %46 : vector<32x128xf32>
    %49 = arith.mulf %43, %48 : vector<32x128xf32>
    %50 = arith.truncf %49 : vector<32x128xf32> to vector<32x128xbf16>
    %cst_33 = arith.constant dense<0.000000e+00> : vector<8x128xf32>
    %51 = tpu.matmul %5, %50, %cst_33 {dimension_numbers = #tpu.dot_dimension_numbers<[1], [0], [0], [1], [0, 0, 1, 1], [], []>} : vector<8x32xbf16>, vector<32x128xbf16>, vector<8x128xf32> -> vector<8x128xf32>
    %52 = arith.addf %51, %15 : vector<8x128xf32>
    %53 = arith.addf %16, %52 : vector<8x128xf32>
    %c0_34 = arith.constant 0 : index
    %c0_35 = arith.constant 0 : index
    %54 = vector.load %arg15[%c0_34, %c0_35] : memref<16x128xf32, #tpu.memory_space<vmem>>, vector<8x128xf32>
    tpu.vector_store %arg15[%c0_34, %c0_35], %53 {strides = array<i32>} : memref<16x128xf32, #tpu.memory_space<vmem>>, vector<8x128xf32>,
    %c8 = arith.constant 8 : index
    %c0_36 = arith.constant 0 : index
    %55 = vector.load %arg1[%c8, %c0_36] : memref<16x128xf32, #tpu.memory_space<vmem>>, vector<8x128xf32>
    %cst_37 = arith.constant dense<0.000000e+00> : vector<8xf32>
    %56 = vector.multi_reduction <add>, %55, %cst_37 [1] : vector<8x128xf32> to vector<8xf32>
    %57 = vector.shape_cast %56 : vector<8xf32> to vector<8x1xf32>
    %cst_38 = arith.constant 1.280000e+02 : f32
    %58 = vector.broadcast %cst_38 : f32 to vector<8x1xf32>
    %59 = arith.divf %57, %58 : vector<8x1xf32>
    %60 = vector.broadcast %59 : vector<8x1xf32> to vector<8x128xf32>
    %61 = arith.subf %55, %60 : vector<8x128xf32>
    %62 = arith.mulf %61, %61 : vector<8x128xf32>
    %cst_39 = arith.constant dense<0.000000e+00> : vector<8xf32>
    %63 = vector.multi_reduction <add>, %62, %cst_39 [1] : vector<8x128xf32> to vector<8xf32>
    %64 = vector.shape_cast %63 : vector<8xf32> to vector<8x1xf32>
    %cst_40 = arith.constant 1.280000e+02 : f32
    %65 = vector.broadcast %cst_40 : f32 to vector<8x1xf32>
    %66 = arith.divf %64, %65 : vector<8x1xf32>
    %67 = vector.broadcast %59 : vector<8x1xf32> to vector<8x128xf32>
    %68 = arith.subf %55, %67 : vector<8x128xf32>
    %cst_41 = arith.constant 9.99999974E-6 : f32
    %69 = vector.broadcast %cst_41 : f32 to vector<8x1xf32>
    %70 = arith.addf %66, %69 : vector<8x1xf32>
    %71 = math.rsqrt %70 : vector<8x1xf32>
    %72 = vector.broadcast %71 : vector<8x1xf32> to vector<8x128xf32>
    %73 = arith.mulf %68, %72 : vector<8x128xf32>
    %74 = vector.broadcast %0 : vector<1x128xf32> to vector<8x128xf32>
    %75 = arith.mulf %73, %74 : vector<8x128xf32>
    %76 = vector.broadcast %1 : vector<1x128xf32> to vector<8x128xf32>
    %77 = arith.addf %75, %76 : vector<8x128xf32>
    %78 = arith.truncf %77 : vector<8x128xf32> to vector<8x128xbf16>
    %cst_42 = arith.constant dense<0.000000e+00> : vector<32x128xf32>
    %79 = tpu.matmul %4, %78, %cst_42 {dimension_numbers = #tpu.dot_dimension_numbers<[1], [0], [0], [1], [0, 0, 1, 1], [], []>} : vector<32x8xbf16>, vector<8x128xbf16>, vector<32x128xf32> -> vector<32x128xf32>
    %80 = arith.addf %79, %12 : vector<32x128xf32>
    %cst_43 = arith.constant 5.000000e-01 : f32
    %81 = vector.broadcast %cst_43 : f32 to vector<32x128xf32>
    %82 = arith.mulf %81, %80 : vector<32x128xf32>
    %cst_44 = arith.constant 0.707106769 : f32
    %83 = vector.broadcast %cst_44 : f32 to vector<32x128xf32>
    %84 = arith.mulf %80, %83 : vector<32x128xf32>
    %85 = math.erf %84 : vector<32x128xf32>
    %cst_45 = arith.constant 1.000000e+00 : f32
    %86 = vector.broadcast %cst_45 : f32 to vector<32x128xf32>
    %87 = arith.addf %86, %85 : vector<32x128xf32>
    %88 = arith.mulf %82, %87 : vector<32x128xf32>
    %89 = arith.truncf %88 : vector<32x128xf32> to vector<32x128xbf16>
    %cst_46 = arith.constant dense<0.000000e+00> : vector<8x128xf32>
    %90 = tpu.matmul %5, %89, %cst_46 {dimension_numbers = #tpu.dot_dimension_numbers<[1], [0], [0], [1], [0, 0, 1, 1], [], []>} : vector<8x32xbf16>, vector<32x128xbf16>, vector<8x128xf32> -> vector<8x128xf32>
    %91 = arith.addf %90, %15 : vector<8x128xf32>
    %92 = arith.addf %55, %91 : vector<8x128xf32>
    %c8_47 = arith.constant 8 : index
    %c0_48 = arith.constant 0 : index
    %93 = vector.load %arg15[%c8_47, %c0_48] : memref<16x128xf32, #tpu.memory_space<vmem>>, vector<8x128xf32>
    tpu.vector_store %arg15[%c8_47, %c0_48], %92 {strides = array<i32>} : memref<16x128xf32, #tpu.memory_space<vmem>>, vector<8x128xf32>,
    %c0_49 = arith.constant 0 : index
    %c0_50 = arith.constant 0 : index
    %94 = vector.load %arg15[%c0_49, %c0_50] : memref<16x128xf32, #tpu.memory_space<vmem>>, vector<16x128xf32>
    %cst_51 = arith.constant dense<0.000000e+00> : vector<16xf32>
    %95 = vector.multi_reduction <add>, %94, %cst_51 [1] : vector<16x128xf32> to vector<16xf32>
    %96 = vector.shape_cast %95 : vector<16xf32> to vector<16x1xf32>
    %cst_52 = arith.constant 1.280000e+02 : f32
    %97 = vector.broadcast %cst_52 : f32 to vector<16x1xf32>
    %98 = arith.divf %96, %97 : vector<16x1xf32>
    %99 = vector.broadcast %98 : vector<16x1xf32> to vector<16x128xf32>
    %100 = arith.subf %94, %99 : vector<16x128xf32>
    %101 = arith.mulf %100, %100 : vector<16x128xf32>
    %cst_53 = arith.constant dense<0.000000e+00> : vector<16xf32>
    %102 = vector.multi_reduction <add>, %101, %cst_53 [1] : vector<16x128xf32> to vector<16xf32>
    %103 = vector.shape_cast %102 : vector<16xf32> to vector<16x1xf32>
    %cst_54 = arith.constant 1.280000e+02 : f32
    %104 = vector.broadcast %cst_54 : f32 to vector<16x1xf32>
    %105 = arith.divf %103, %104 : vector<16x1xf32>
    %106 = vector.broadcast %98 : vector<16x1xf32> to vector<16x128xf32>
    %107 = arith.subf %94, %106 : vector<16x128xf32>
    %cst_55 = arith.constant 9.99999974E-6 : f32
    %108 = vector.broadcast %cst_55 : f32 to vector<16x1xf32>
    %109 = arith.addf %105, %108 : vector<16x1xf32>
    %110 = math.rsqrt %109 : vector<16x1xf32>
    %111 = vector.broadcast %110 : vector<16x1xf32> to vector<16x128xf32>
    %112 = arith.mulf %107, %111 : vector<16x128xf32>
    %113 = vector.broadcast %2 : vector<1x128xf32> to vector<16x128xf32>
    %114 = arith.mulf %112, %113 : vector<16x128xf32>
    %115 = vector.broadcast %3 : vector<1x128xf32> to vector<16x128xf32>
    %116 = arith.addf %114, %115 : vector<16x128xf32>
    %117 = arith.truncf %116 : vector<16x128xf32> to vector<16x128xbf16>
    %cst_56 = arith.constant dense<0.000000e+00> : vector<16x256xf32>
    %118 = tpu.matmul %117, %6, %cst_56 {dimension_numbers = #tpu.dot_dimension_numbers<[1], [0], [0], [1], [0, 0, 1, 1], [], []>} : vector<16x128xbf16>, vector<128x256xbf16>, vector<16x256xf32> -> vector<16x256xf32>
    %119 = vector.broadcast %8 : vector<1x256xf32> to vector<16x256xf32>
    %120 = arith.addf %118, %119 : vector<16x256xf32>
    %cst_57 = arith.constant 5.000000e-01 : f32
    %121 = vector.broadcast %cst_57 : f32 to vector<16x256xf32>
    %122 = arith.mulf %121, %120 : vector<16x256xf32>
    %cst_58 = arith.constant 0.707106769 : f32
    %123 = vector.broadcast %cst_58 : f32 to vector<16x256xf32>
    %124 = arith.mulf %120, %123 : vector<16x256xf32>
    %125 = math.erf %124 : vector<16x256xf32>
    %cst_59 = arith.constant 1.000000e+00 : f32
    %126 = vector.broadcast %cst_59 : f32 to vector<16x256xf32>
    %127 = arith.addf %126, %125 : vector<16x256xf32>
    %128 = arith.mulf %122, %127 : vector<16x256xf32>
    %129 = arith.truncf %128 : vector<16x256xf32> to vector<16x256xbf16>
    %cst_60 = arith.constant dense<0.000000e+00> : vector<16x128xf32>
    %130 = tpu.matmul %129, %7, %cst_60 {dimension_numbers = #tpu.dot_dimension_numbers<[1], [0], [0], [1], [0, 0, 1, 1], [], []>} : vector<16x256xbf16>, vector<256x128xbf16>, vector<16x128xf32> -> vector<16x128xf32>
    %131 = vector.broadcast %9 : vector<1x128xf32> to vector<16x128xf32>
    %132 = arith.addf %130, %131 : vector<16x128xf32>
    %c0_61 = arith.constant 0 : index
    %c0_62 = arith.constant 0 : index
    %133 = vector.load %arg1[%c0_61, %c0_62] : memref<16x128xf32, #tpu.memory_space<vmem>>, vector<16x128xf32>
    %134 = arith.addf %132, %133 : vector<16x128xf32>
    %c0_63 = arith.constant 0 : index
    %c0_64 = arith.constant 0 : index
    %135 = vector.load %arg14[%c0_63, %c0_64] : memref<16x128xf32, #tpu.memory_space<vmem>>, vector<16x128xf32>
    tpu.vector_store %arg14[%c0_63, %c0_64], %134 {strides = array<i32>} : memref<16x128xf32, #tpu.memory_space<vmem>>, vector<16x128xf32>,
    return
  }
  func.func @transform_0(%arg0: i32) -> (i32, i32) {
    %c0_i32 = arith.constant 0 : i32
    %c0_i32_0 = arith.constant 0 : i32
    return %arg0, %c0_i32 : i32, i32
  }
  func.func @transform_1(%arg0: i32) -> (i32, i32) {
    %c0_i32 = arith.constant 0 : i32
    %c0_i32_0 = arith.constant 0 : i32
    %c0_i32_1 = arith.constant 0 : i32
    return %c0_i32, %c0_i32_0 : i32, i32
  }
  func.func @transform_2(%arg0: i32) -> (i32, i32) {
    %c0_i32 = arith.constant 0 : i32
    %c0_i32_0 = arith.constant 0 : i32
    %c0_i32_1 = arith.constant 0 : i32
    return %c0_i32, %c0_i32_0 : i32, i32
  }
  func.func @transform_3(%arg0: i32) -> (i32, i32) {
    %c0_i32 = arith.constant 0 : i32
    %c0_i32_0 = arith.constant 0 : i32
    %c0_i32_1 = arith.constant 0 : i32
    return %c0_i32, %c0_i32_0 : i32, i32
  }
  func.func @transform_4(%arg0: i32) -> (i32, i32) {
    %c0_i32 = arith.constant 0 : i32
    %c0_i32_0 = arith.constant 0 : i32
    %c0_i32_1 = arith.constant 0 : i32
    return %c0_i32, %c0_i32_0 : i32, i32
  }
  func.func @transform_5(%arg0: i32) -> (i32, i32) {
    %c0_i32 = arith.constant 0 : i32
    %c0_i32_0 = arith.constant 0 : i32
    %c0_i32_1 = arith.constant 0 : i32
    return %c0_i32, %c0_i32_0 : i32, i32
  }
  func.func @transform_6(%arg0: i32) -> (i32, i32) {
    %c0_i32 = arith.constant 0 : i32
    %c0_i32_0 = arith.constant 0 : i32
    %c0_i32_1 = arith.constant 0 : i32
    return %c0_i32, %c0_i32_0 : i32, i32
  }
  func.func @transform_7(%arg0: i32) -> (i32, i32) {
    %c0_i32 = arith.constant 0 : i32
    %c0_i32_0 = arith.constant 0 : i32
    %c0_i32_1 = arith.constant 0 : i32
    return %c0_i32, %c0_i32_0 : i32, i32
  }
  func.func @transform_8(%arg0: i32) -> (i32, i32) {
    %c0_i32 = arith.constant 0 : i32
    %c0_i32_0 = arith.constant 0 : i32
    %c0_i32_1 = arith.constant 0 : i32
    return %c0_i32, %c0_i32_0 : i32, i32
  }
  func.func @transform_9(%arg0: i32) -> (i32, i32) {
    %c0_i32 = arith.constant 0 : i32
    %c0_i32_0 = arith.constant 0 : i32
    %c0_i32_1 = arith.constant 0 : i32
    return %c0_i32, %c0_i32_0 : i32, i32
  }
  func.func @transform_10(%arg0: i32) -> (i32, i32) {
    %c0_i32 = arith.constant 0 : i32
    %c0_i32_0 = arith.constant 0 : i32
    %c0_i32_1 = arith.constant 0 : i32
    return %c0_i32, %c0_i32_0 : i32, i32
  }
  func.func @transform_11(%arg0: i32) -> (i32, i32) {
    %c0_i32 = arith.constant 0 : i32
    %c0_i32_0 = arith.constant 0 : i32
    %c0_i32_1 = arith.constant 0 : i32
    return %c0_i32, %c0_i32_0 : i32, i32
  }
  func.func @transform_12(%arg0: i32) -> (i32, i32) {
    %c0_i32 = arith.constant 0 : i32
    %c0_i32_0 = arith.constant 0 : i32
    %c0_i32_1 = arith.constant 0 : i32
    return %c0_i32, %c0_i32_0 : i32, i32
  }
  func.func @transform_13(%arg0: i32) -> (i32, i32) {
    %c0_i32 = arith.constant 0 : i32
    %c0_i32_0 = arith.constant 0 : i32
    return %arg0, %c0_i32 : i32, i32
  }
}

</mosaic_0001>

<bundles_post_ra>
// kernel: tpu_custom_call.1
= control target key start
LH: loop header
LB: loop body
LE: loop exit
PB: predicated region body
PF: predicated region fallthrough
CT: control target
= control target key end

     0   :  { %s2893_s0 = inlined_call_operand.hbm [shape: f32[64,128], index: 0, kind: input, shape index: {}]   ;;  %s2894_s1 = inlined_call_operand.vmem [shape: f32[1,128], index: 1, kind: input, shape index: {}]   ;;  %s2895_s2 = inlined_call_operand.vmem [shape: f32[1,128], index: 2, kind: input, shape index: {}]   ;;  %s2896_s3 = inlined_call_operand.vmem [shape: bf16[32,8], index: 3, kind: input, shape index: {}]   ;;  %s2897_s4 = inlined_call_operand.vmem [shape: f32[32,1], index: 4, kind: input, shape index: {}]   ;;  %s2898_s5 = inlined_call_operand.vmem [shape: bf16[8,32], index: 5, kind: input, shape index: {}]   ;;  %s2899_s6 = inlined_call_operand.vmem [shape: f32[8,1], index: 6, kind: input, shape index: {}]   ;;  %s2900_s7 = inlined_call_operand.vmem [shape: f32[1,128], index: 7, kind: input, shape index: {}]   ;;  %s2901_s8 = inlined_call_operand.vmem [shape: f32[1,128], index: 8, kind: input, shape index: {}]   ;;  %s2902_s9 = inlined_call_operand.hbm [shape: bf16[128,256], index: 9, kind: input, shape index: {}]   ;;  %s2903_s10 = inlined_call_operand.vmem [shape: f32[1,256], index: 10, kind: input, shape index: {}]   ;;  %s2904_s11 = inlined_call_operand.hbm [shape: bf16[256,128], index: 11, kind: input, shape index: {}]   ;;  %s2905_s12 = inlined_call_operand.vmem [shape: f32[1,128], index: 12, kind: input, shape index: {}]   ;;  %s2906_s13 = inlined_call_operand.hbm [shape: f32[64,128], index: 13, kind: output, shape index: {}]  }
   0x1   :  { %2914 = sst [smem:[#allocation18_spill]] %s2902_s9 }
   0x2   :  { %2915 = sst [smem:[#allocation19_spill]] %s2904_s11 }
   0x3   :  { %18 = vsyncpa [#allocation4], 0 }
   0x4   :  { %20 = vsyncpa [#allocation4 + $0x1], 0 }
   0x5   :  { %21 = vsyncpa [#allocation7], 0 }
   0x6   :  { %22 = vsyncpa [#allocation5], 0 }
   0x7   :  { %24 = vsyncpa [#allocation5 + $0x1], 0  ;;  %s2251_s25 = smov 0   ;;  %s2253_s26 = smov 0  }
   0x8   :  { %s2255_s27 = smov 0   ;;  %s2257_s28 = smov 0  }
   0x9 LB: > { %2916 = sst [smem:[#allocation13_spill]] %s2157_s25  ;;  %s2272_s29 = sadd.s32 4294967295, %s2169_s28   ;;  %s2169_s28 = sphi %s2257_s28, %s2944_s28   ;;  %s2165_s27 = sphi %s2255_s27, %s2949_s27   ;;  %s2161_s26 = sphi %s2253_s26, %s2948_s26   ;;  %s2157_s25 = sphi %s2251_s25, %s2947_s25  }
   0xa   : > { %2917 = sst [smem:[#allocation14_spill]] %s2165_s27  ;;  %s1684_s30 = sadd.s32 4294967294, %s2169_s28  }
   0xb   : > { %p50_p0 = scmp.ne.s32.totalorder %s2161_s26, %s2157_s25  ;;  %p51_p1 = scmp.eq.s32.totalorder %s2272_s29, 0 }
   0xc   : > { %p326_p2 = scmp.eq.s32.totalorder %s2272_s29, 3  ;;  %p332_p3 = scmp.eq.s32.totalorder %s1684_s30, 3 }
   0xd   : > { %p2281_p4 = por %p51_p1, %p50_p0  ;;  %p1685_p5 = scmp.ge.s32.totalorder %s2169_s28, 1 }
   0xe   : > { %p2286_p6 = por %p332_p3, %p50_p0  ;;  %p339_p7 = scmp.lt.s32.totalorder %s2169_s28, 5 }
   0xf   : > { %s2921_s9 = sld [smem:[#allocation18_spill]]  ;;  %s2171_s20 = smov [#allocation6]  }
  0x10   : > { %s2919_s15 = scalar_select %p2286_p6, 1, 0 }
  0x11   : > { %p2294_p8 = pnand %p1685_p5, %p339_p7  ;;  %s376_s21 = sshll.u32 %s2171_s20, 4  ;;  %s377_s21 = int_to_ptr.vmem [resolvable:$true] %s376_s21 }
  0x12   : > { %2920 = sst [smem:[#allocation15_spill]] %s2919_s15  ;;  %s2909_s30 = smov 128  }
  0x13   : > { %p1904_p9 = pneg %p2294_p8  ;;  %s2923_s11 = sld [smem:[#allocation19_spill]] }
  0x14   : > { %s2910_s16 = smov 8   ;;  %s2174_s17 = smov [#allocation8]  }
  0x15   : > { %s374_s18 = sshll.u32 %s2921_s9, 4  ;;  %p1905_p10 = pnand %p1904_p9, %p51_p1  ;;  %s375_s18 = int_to_ptr.hbm [resolvable:$true] %s374_s18 }
  0x16   : > { %s393_s20 = sshll.u32 %s2174_s17, 4  ;;  %s2175_s22 = smov 64   ;;  %s394_s20 = int_to_ptr.vmem [resolvable:$true] %s393_s20 }
  0x17   : > { %1907 = dma.hbm_to_vmem [thread:$0]  (!%p1905_p10), %s375_s18, 2048, %s377_s21, [#allocation7], %s2909_s30, %s2909_s30, %s2910_s16  }
  0x18   : > { %s2176_s23 = smov 4   ;;  %s2309_s9 = sadd.s32 1, %s2169_s28  }
  0x19   : > { %s391_s24 = sshll.u32 %s2923_s11, 4  ;;  %2924 = sst [smem:[#allocation16_spill]] %s2309_s9  ;;  %s392_s24 = int_to_ptr.hbm [resolvable:$true] %s391_s24 }
  0x1a   : > { %1910 = dma.hbm_to_vmem [thread:$0]  (!%p1905_p10), %s392_s24, 2048, %s394_s20, [#allocation7], %s2175_s22, %s2175_s22, %s2176_s23  }
  0x1b   : > { %s34_s11 = ssub.s32 %s2169_s28, %s2309_s9  ;;  %s37_s15 = sadd.s32 1, %s2165_s27 }
  0x1c   : > { %p35_p11 = scmp.eq.s32.totalorder %s34_s11, 0  ;;  %p44_p12 = scmp.ne.s32.totalorder %s2165_s27, %s2161_s26 }
  0x1d   : > { %p45_p13 = scmp.eq.s32.totalorder %s2169_s28, 0  ;;  %p1921_p5 = scmp.lt.s32.totalorder %s2169_s28, 4 }
  0x1e   : > { %s2318_s25 = scalar_select %p35_p11, %s2165_s27, %s37_s15  }
  0x1f   : > { %p46_p0 = por %p45_p13, %p44_p12  ;;  %p2322_p3 = por %p326_p2, %p44_p12 }
  0x20   : > { %2925 = sst [smem:[#allocation17_spill]] %s2318_s25  ;;  %s410_s21 = sand.u32 1, %s2165_s27  }
  0x21   : > { %s1689_s17 = sshll.u32 %s410_s21, 4  ;;  %s1856_s24 = sshll.u32 %s2169_s28, 4 }
  0x22   : > { %s419_s23 = scalar_lea.hbm %s2893_s0, %s1856_s24  ;;  %s414_s11 = scalar_lea.vmem [#allocation3], %s1689_s17 }
  0x23   : > { %s422_s30 = sshll.u32 %s414_s11, 4  ;;  %s420_s16 = sshll.u32 %s419_s23, 4  ;;  %s423_s30 = int_to_ptr.vmem [resolvable:$true] %s422_s30  ;;  %s421_s16 = int_to_ptr.hbm [resolvable:$true] %s420_s16 }
  0x24   : > { %p2332_p7 = pnand %p1921_p5, %p46_p0  ;;  %s411_s25 = scalar_lea.sflag [#allocation4], %s410_s21 }
  0x25   : > { %s2069_s9 = sshra.s32 %s421_s16, 4  ;;  %s2076_s20 = scalar_lea.hbm %s2893_s0, 64  ;;  %s2070_s9 = int_to_ptr.hbm [resolvable:$true] %s2069_s9 }
  0x26   : > { %s2071_s27 = scalar_lea.hbm %s2070_s9, 16  ;;  %p2073_p9 = pneg %p2332_p7 }
  0x27   : > { %p2072_p2 = scmp.ne.s32.totalorder %s2070_s9, %s2071_s27  ;;  %p2077_p12 = scmp.lt.s32.totalorder %s2070_s9, %s2893_s0 }
  0x28   : > { %p2078_p13 = scmp.lt.s32.totalorder %s2076_s20, %s2071_s27 }
  0x29   : > { %p2074_p10 = pnand %p2073_p9, %p2072_p2 }
  0x2a   : > { %p2079_p0 = por %p2078_p13, %p2077_p12 }
  0x2b   : > { %p2075_p11 = pneg %p2074_p10 }
  0x2d   : > { %p2080_p5 = pnand %p2079_p0, %p2075_p11 }
  0x2f   : > { %2083 = shalt.err (!%p2080_p5)
}
  0x30   : > { %s2928_s21 = smov 8   ;;  %s2929_s11 = smov 128  }
  0x31   : > { %1914 = dma.hbm_to_vmem [thread:$0]  (!%p2332_p7), %s421_s16, 256, %s423_s30, %s411_s25, %s2929_s11, %s2929_s11, %s2928_s21  }
  0x32   : > { %434 = sbr.rel (%p2294_p8) target bundleno = 1322 (0x52a), region = 72  ;;  %s2352_s24 = sand.u32 (!%p2294_p8), 1, %s2161_s26  }
  0x33   : > { %s1693_s9 = sshll.u32 (!%p2294_p8), %s2352_s24, 4  ;;  %s437_s27 = scalar_lea.sflag (!%p2294_p8), [#allocation4], %s2352_s24 }
  0x34   : > { %s2358_s17 = scalar_lea.vmem (!%p2294_p8), [#allocation3], %s1693_s9 }
  0x37   : > { %2144 = dma.done.wait (%p2281_p4), %s437_s27, 256  }
  0x38   : > { %2146 = vsyncadd (%p2281_p4), %s437_s27, 4294967040 }
  0x39   : > { %2148 = dma.done.wait (%p51_p1), [#allocation7], 4096  }
  0x3a   : > { %2150 = vsyncadd (%p51_p1), [#allocation7], 4294963200  ;;  %v2369_v0 = vld [vmem:[%s2358_s17 + $0x8] sm:$0xff]  ;;  %v2373_v1 = vld [vmem:[%s2358_s17] sm:$0xff]  ;;  %v2177_v2 = vmov 128.0   ;;  %v2178_v25 = vmov 0  }
  0x3b   : > { %861 = vadd.xlane.f32.xlu0 %v2369_v0  ;;  %1975 = vrcp.f32 %v2177_v2  ;;  %1969 = vset.pattern.permute.xlu1 %v2178_v25  ;;  %v556_v30 = vld [vmem:[%s2897_s4] sm:$0xff]  ;;  %v557_v42 = vld [vmem:[%s2897_s4 + $0x8] sm:$0xff]  ;;  %v558_v43 = vld [vmem:[%s2897_s4 + $0x10] sm:$0xff]  ;;  %vm640_vm6 = vcmask 1043456   ;;  %vm633_vm8 = vcmask 64512   ;;  %s1891_s16 = sshll.u32 %s2272_s29, 4 }
  0x3c   : > { %1968 = vset.pattern.permute.xlu0 %v2178_v25  ;;  %1967 = vset.pattern.permute.xlu2 %v2178_v25  ;;  %v1970_v33 = vld [vmem:[%s2894_s1] ss:$0 sm:$0xff]  ;;  %v559_v51 = vld [vmem:[%s2897_s4 + $0x18] sm:$0xff]  ;;  %v1858_v56 = vld [vmem:[%s2896_s3 + $0x8] sm:$0xff]  ;;  %s493_s15 = scalar_lea.vmem [#allocation9], %s1693_s9  ;;  %s1588_s23 = scalar_lea.hbm %s2906_s13, %s1891_s16 }
  0x3d   : > { %v1971_v36 = vld [vmem:[%s2895_s2] ss:$0 sm:$0xff]  ;;  %572 = vperm.xlu2 %1967, %v558_v43   ;;  %s1589_s21 = sshll.u32 %s493_s15, 4  ;;  %s1591_s11 = sshll.u32 %s1588_s23, 4  ;;  %s1590_s21 = int_to_ptr.vmem [resolvable:$true] %s1589_s21  ;;  %s1592_s11 = int_to_ptr.hbm [resolvable:$true] %s1591_s11 }
  0x3e   : > { %v1857_v48 = vld [vmem:[%s2896_s3] sm:$0xff]  ;;  %s1577_s29 = scalar_lea.sflag [#allocation5], %s2352_s24  ;;  %s2113_s27 = sshra.s32 %s1592_s11, 4  ;;  %s2114_s27 = int_to_ptr.hbm [resolvable:$true] %s2113_s27 }
  0x3f   : > { %v580_v55 = vld [vmem:[%s2899_s6] sm:$0xff]  ;;  %s2115_s9 = scalar_lea.hbm %s2114_s27, 16  ;;  %s2119_s19 = scalar_lea.hbm %s2906_s13, 64 }
  0x40   : > { %p2116_p1 = scmp.ne.s32.totalorder %s2114_s27, %s2115_s9  ;;  %p2120_p7 = scmp.lt.s32.totalorder %s2114_s27, %s2906_s13 }
  0x41   : > { %v1976_v3 = vpop.eup %1975  ;;  %p2121_p2 = scmp.lt.s32.totalorder %s2119_s19, %s2115_s9 }
  0x42   : > { %v590_v4 = vmul.f32 128.0, %v1976_v3  ;;  %vm594_vm0 = vweird.f32 %v1976_v3  ;;  %p2117_p4 = pnand %p2116_p1, %p2322_p3 }
  0x43   : > { %587 = vadd.xlane.f32.xlu0 %v2373_v1  ;;  %p2122_p9 = por %p2121_p2, %p2120_p7 }
  0x44   : > { %v591_v5 = vsub.f32 1.0, %v590_v4  ;;  %p2118_p8 = pneg %p2117_p4 }
  0x45   : > { %577 = vperm.xlu2 %1967, %v559_v51  }
  0x46   : > { %v592_v6 = vmul.f32 %v1976_v3, %v591_v5  ;;  %p2123_p10 = pnand %p2122_p9, %p2118_p8 }
  0x48   : > { %v593_v7 = vadd.f32 %v1976_v3, %v592_v6 }
  0x4a   : > { %v2376_v8 = vsel %vm594_vm0, %v1976_v3, %v593_v7 }
  0x4d   : > { %583 = vperm.xlu2 %1967, %v580_v55  }
  0x57   : > { %562 = vperm.xlu0 %1968, %v556_v30  }
  0xae   : > { %v862_v9 = vpop.xlane.xlu0 %861 }
  0xaf   : > { %v863_v10 = vmul.f32 %v862_v9, %v2376_v8 }
  0xb1   : > { %v864_v11 = vsub.f32 %v2369_v0, %v863_v10 }
  0xb3   : > { %v865_v12 = vmul.f32 %v864_v11, %v864_v11 }
  0xb5   : > { %866 = vadd.xlane.f32.xlu1 %v865_v12 }
  0xb6   : > { %v588_v13 = vpop.xlane.xlu0 %587 }
  0xb7   : > { %v596_v14 = vmul.f32 %v2376_v8, %v588_v13 }
  0xb9   : > { %v597_v15 = vsub.f32 %v2373_v1, %v596_v14  ;;  %v573_v14 = vpop.permute.xlu2 %572 }
  0xbb   : > { %v598_v16 = vmul.f32 %v597_v15, %v597_v15 }
  0xbd   : > { %599 = vadd.xlane.f32.xlu1 %v598_v16 }
  0xc9   : > { %v563_v57 = vpop.permute.xlu0 %562 }
  0xd6   : > { %567 = vperm.xlu1 %1969, %v557_v42  }
 0x128   : > { %v867_v17 = vpop.xlane.xlu1 %866 }
 0x129   : > { %v868_v18 = vmul.f32 %v867_v17, %v2376_v8 }
 0x12b   : > { %v869_v19 = vadd.f32 1e-05, %v868_v18 }
 0x12d   : > { %1977 = vrsqrt.f32 %v869_v19  ;;  %vm876_vm2 = vweird.f32 %v869_v19 }
 0x130   : > { %v600_v20 = vpop.xlane.xlu1 %599 }
 0x131   : > { %v601_v21 = vmul.f32 %v600_v20, %v2376_v8 }
 0x133   : > { %v1978_v22 = vpop.eup %1977  ;;  %v602_v23 = vadd.f32 1e-05, %v601_v21 }
 0x134   : > { %v871_v24 = vmul.f32 %v1978_v22, %v869_v19  ;;  %vm877_vm1 = vweird.f32 %v1978_v22 }
 0x135   : > { %1979 = vrsqrt.f32 %v602_v23  ;;  %vm878_vm3 = vmor %vm876_vm2, %vm877_vm1  ;;  %vm609_vm5 = vweird.f32 %v602_v23 }
 0x136   : > { %v872_v26 = vmul.f32 %v1978_v22, %v871_v24 }
 0x138   : > { %v873_v27 = vmul.f32 0.5, %v872_v26 }
 0x13a   : > { %v874_v28 = vsub.f32 1.5, %v873_v27 }
 0x13b   : > { %v1980_v29 = vpop.eup %1979 }
 0x13c   : > { %v875_v31 = vmul.f32 %v1978_v22, %v874_v28  ;;  %v604_v32 = vmul.f32 %v1980_v29, %v602_v23  ;;  %vm610_vm4 = vweird.f32 %v1980_v29 }
 0x13d   : > { %vm611_vm7 = vmor %vm609_vm5, %vm610_vm4 }
 0x13e   : > { %v605_v34 = vmul.f32 %v1980_v29, %v604_v32  ;;  %v879_v35 = vsel %vm878_vm3, %v1978_v22, %v875_v31 }
 0x13f   : > { %v880_v37 = vmul.f32 %v879_v35, %v864_v11  ;;  %v578_v35 = vpop.permute.xlu2 %577 }
 0x140   : > { %v606_v38 = vmul.f32 0.5, %v605_v34 }
 0x141   : > { %v881_v39 = vmul.f32 %v1970_v33, %v880_v37 }
 0x142   : > { %v607_v40 = vsub.f32 1.5, %v606_v38 }
 0x143   : > { %v882_v41 = vadd.f32 %v1971_v36, %v881_v39 }
 0x144   : > { %v608_v44 = vmul.f32 %v1980_v29, %v607_v40 }
 0x145   : > { %v883_v45 = vpack.c.bf16 %v882_v41, %v882_v41 }
 0x146   : > { %v612_v46 = vsel %vm611_vm7, %v1980_v29, %v608_v44 }
 0x147   : > { %v885_v47 = vsel %vm640_vm6, %v883_v45, 0  ;;  %v613_v49 = vmul.f32 %v612_v46, %v597_v15 }
 0x148   : > { %894 = vmatpush.bf16.msra.mxu2 %v885_v47  ;;  %v568_v5 = vpop.permute.xlu1 %567 }
 0x149   : > { %v617_v50 = vmul.f32 %v1970_v33, %v613_v49 }
 0x14b   : > { %1712 = vmatmul.msk.bf16.vlgmr.msra.gmra.mxu2 %vm633_vm8, %v1857_v48  ;;  %v621_v52 = vadd.f32 %v1971_v36, %v617_v50 }
 0x14d   : > { %v622_v53 = vpack.c.bf16 %v621_v52, %v621_v52 }
 0x14f   : > { %v642_v54 = vsel %vm640_vm6, %v622_v53, 0 }
 0x150   : > { %651 = vmatpush.bf16.msra.mxu0 %v642_v54 }
 0x153   : > { %1705 = vmatmul.msk.bf16.vlgmr.msra.gmra.mxu0 %vm633_vm8, %v1857_v48 }
 0x15b   : > { %1713 = vmatmul.msk.bf16.gmra.mxu2 %vm633_vm8, %v1858_v56 }
 0x163   : > { %1706 = vmatmul.msk.bf16.gmra.mxu0 %vm633_vm8, %v1858_v56 }
 0x1ce   : > { %v896_v58 = vpop.f32.mrf.mxu2 }
 0x1cf   : > { %v2413_v59 = vadd.f32 %v896_v58, %v563_v57 }
 0x1d0   : > { %v653_v60 = vpop.f32.mrf.mxu0 }
 0x1d1   : > { %v2416_v61 = vmul.f32 0.70710677, %v2413_v59  ;;  %v2418_v62 = vadd.f32 %v653_v60, %v563_v57 }
 0x1d3   : > { %v914_v63 = vmul.f32 %v2416_v61, %v2416_v61  ;;  %v2423_v2 = vmul.f32 0.70710677, %v2418_v62 }
 0x1d5   : > { %v2425_v3 = vmin.f32 %v914_v63, 16.0  ;;  %v671_v4 = vmul.f32 %v2423_v2, %v2423_v2 }
 0x1d6   : > { %v898_v6 = vpop.f32.mrf.mxu2 }
 0x1d7   : > { %v2429_v7 = vadd.f32 %v898_v6, %v568_v5  ;;  %v916_v10 = vmul.f32 2.1237322e-06, %v2425_v3  ;;  %v2432_v11 = vmin.f32 %v671_v4, 16.0  ;;  %v927_v13 = vmul.f32 3.8918573e-05, %v2425_v3 }
 0x1d8   : > { %v655_v9 = vpop.f32.mrf.mxu0 }
 0x1d9   : > { %v2434_v12 = vadd.f32 %v655_v9, %v568_v5  ;;  %v2438_v15 = vmul.f32 0.70710677, %v2429_v7  ;;  %v917_v16 = vadd.f32 0.00028619796, %v916_v10  ;;  %v673_v17 = vmul.f32 2.1237322e-06, %v2432_v11 }
 0x1da   : > { %v928_v21 = vadd.f32 0.001143296, %v927_v13 }
 0x1db   : > { %v2442_v19 = vmul.f32 0.70710677, %v2434_v12  ;;  %v954_v22 = vmul.f32 %v2438_v15, %v2438_v15  ;;  %v918_v24 = vmul.f32 %v917_v16, %v2425_v3  ;;  %v674_v25 = vadd.f32 0.00028619796, %v673_v17 }
 0x1dc   : > { %v929_v29 = vmul.f32 %v928_v21, %v2425_v3 }
 0x1dd   : > { %v711_v28 = vmul.f32 %v2442_v19, %v2442_v19  ;;  %v2454_v30 = vmin.f32 %v954_v22, 16.0  ;;  %v919_v33 = vadd.f32 0.0036580483, %v918_v24  ;;  %v675_v34 = vmul.f32 %v674_v25, %v2432_v11 }
 0x1de   : > { %v901_v18 = vpop.f32.mrf.mxu2  ;;  %v930_v41 = vadd.f32 0.014752088, %v929_v29 }
 0x1df   : > { %v902_v20 = vadd.f32 %v901_v18, %v573_v14  ;;  %v2466_v39 = vmin.f32 %v711_v28, 16.0  ;;  %v956_v42 = vmul.f32 2.1237322e-06, %v2454_v30  ;;  %v920_v46 = vmul.f32 %v919_v33, %v2425_v3 }
 0x1e0   : > { %v658_v23 = vpop.f32.mrf.mxu0  ;;  %v676_v47 = vadd.f32 0.0036580483, %v675_v34  ;;  %v931_v54 = vmul.f32 %v930_v41, %v2425_v3  ;;  %v967_v58 = vmul.f32 3.8918573e-05, %v2454_v30 }
 0x1e1   : > { %v2447_v26 = vmul.f32 0.70710677, %v902_v20  ;;  %v2449_v27 = vadd.f32 %v658_v23, %v573_v14  ;;  %v713_v52 = vmul.f32 2.1237322e-06, %v2466_v39  ;;  %v957_v55 = vadd.f32 0.00028619796, %v956_v42 }
 0x1e2   : > { %v921_v60 = vadd.f32 0.05243302, %v920_v46  ;;  %v677_v63 = vmul.f32 %v676_v47, %v2432_v11  ;;  %v2492_v6 = vmul.f32 0.5, %v902_v20  ;;  %v932_v18 = vadd.f32 0.112945676, %v931_v54 }
 0x1e3   : > { %v994_v31 = vmul.f32 %v2447_v26, %v2447_v26  ;;  %v2459_v32 = vmul.f32 0.70710677, %v2449_v27  ;;  %v714_v14 = vadd.f32 0.00028619796, %v713_v52  ;;  %v958_v21 = vmul.f32 %v957_v55, %v2454_v30 }
 0x1e4   : > { %v922_v20 = vmul.f32 %v921_v60, %v2425_v3  ;;  %v968_v46 = vadd.f32 0.001143296, %v967_v58 }
 0x1e5   : > { %v2462_v36 = vmin.f32 %v994_v31, 16.0  ;;  %v751_v37 = vmul.f32 %v2459_v32, %v2459_v32  ;;  %v959_v42 = vadd.f32 0.0036580483, %v958_v21  ;;  %v715_v52 = vmul.f32 %v714_v14, %v2466_v39 }
 0x1e6   : > { %v903_v38 = vpop.f32.mrf.mxu2  ;;  %v923_v47 = vadd.f32 0.18741608, %v922_v20 }
 0x1e7   : > { %v2468_v40 = vadd.f32 %v903_v38, %v578_v35  ;;  %v996_v43 = vmul.f32 2.1237322e-06, %v2462_v36  ;;  %v2472_v44 = vmin.f32 %v751_v37, 16.0  ;;  %v1007_v51 = vmul.f32 3.8918573e-05, %v2462_v36 }
 0x1e8   : > { %v660_v45 = vpop.f32.mrf.mxu0  ;;  %v2509_v37 = vadd.f32 0.05243302, %v677_v63  ;;  %v960_v58 = vmul.f32 %v959_v42, %v2454_v30 }
 0x1e9   : > { %v997_v48 = vadd.f32 0.00028619796, %v996_v43  ;;  %v753_v49 = vmul.f32 2.1237322e-06, %v2472_v44  ;;  %v2476_v50 = vadd.f32 %v660_v45, %v578_v35  ;;  %v2481_v53 = vmul.f32 0.70710677, %v2468_v40 }
 0x1ea   : > { %v1008_v13 = vadd.f32 0.001143296, %v1007_v51  ;;  %v764_v35 = vmul.f32 3.8918573e-05, %v2472_v44 }
 0x1eb   : > { %v998_v56 = vmul.f32 %v997_v48, %v2462_v36  ;;  %v754_v57 = vadd.f32 0.00028619796, %v753_v49  ;;  %v1034_v4 = vmul.f32 %v2481_v53, %v2481_v53  ;;  %v2490_v5 = vmul.f32 0.70710677, %v2476_v50 }
 0x1ec   : > { %v1009_v24 = vmul.f32 %v1008_v13, %v2462_v36 }
 0x1ed   : > { %v999_v9 = vadd.f32 0.0036580483, %v998_v56  ;;  %v755_v10 = vmul.f32 %v754_v57, %v2472_v44  ;;  %v2495_v16 = vmin.f32 %v1034_v4, 16.0  ;;  %v791_v17 = vmul.f32 %v2490_v5, %v2490_v5 }
 0x1ee   : > { %v1010_v34 = vadd.f32 0.014752088, %v1009_v24  ;;  %v765_v56 = vadd.f32 0.001143296, %v764_v35  ;;  %v961_v35 = vadd.f32 0.05243302, %v960_v58 }
 0x1ef   : > { %v1000_v22 = vmul.f32 %v999_v9, %v2462_v36  ;;  %v756_v23 = vadd.f32 0.0036580483, %v755_v10  ;;  %v1036_v25 = vmul.f32 2.1237322e-06, %v2495_v16  ;;  %v2504_v28 = vmin.f32 %v791_v17, 16.0 }
 0x1f0   : > { %v1047_v29 = vmul.f32 3.8918573e-05, %v2495_v16  ;;  %v1011_v45 = vmul.f32 %v1010_v34, %v2462_v36  ;;  %v766_v13 = vmul.f32 %v765_v56, %v2472_v44  ;;  %v2539_v58 = vmul.f32 0.5, %v2449_v27 }
 0x1f1   : > { %v1001_v31 = vadd.f32 0.05243302, %v1000_v22  ;;  %v757_v33 = vmul.f32 %v756_v23, %v2472_v44  ;;  %v1037_v38 = vadd.f32 0.00028619796, %v1036_v25  ;;  %v793_v41 = vmul.f32 2.1237322e-06, %v2504_v28 }
 0x1f2   : > { %v1048_v51 = vadd.f32 0.001143296, %v1047_v29  ;;  %v1012_v55 = vadd.f32 0.112945676, %v1011_v45  ;;  %v804_v4 = vmul.f32 3.8918573e-05, %v2504_v28  ;;  %v933_v25 = vmul.f32 %v932_v18, %v2425_v3 }
 0x1f3   : > { %v758_v43 = vadd.f32 0.05243302, %v757_v33  ;;  %v1038_v48 = vmul.f32 %v1037_v38, %v2495_v16  ;;  %v794_v49 = vadd.f32 0.00028619796, %v793_v41  ;;  %v1002_v54 = vmul.f32 %v1001_v31, %v2462_v36 }
 0x1f4   : > { %v1049_v63 = vmul.f32 %v1048_v51, %v2495_v16  ;;  %v1013_v10 = vmul.f32 %v1012_v55, %v2462_v36  ;;  %v805_v22 = vadd.f32 0.001143296, %v804_v4  ;;  %v767_v20 = vadd.f32 0.014752088, %v766_v13 }
 0x1f5   : > { %v1039_v57 = vadd.f32 0.0036580483, %v1038_v48  ;;  %v795_v60 = vmul.f32 %v794_v49, %v2504_v28  ;;  %v759_v9 = vmul.f32 %v758_v43, %v2472_v44  ;;  %v1003_v23 = vadd.f32 0.18741608, %v1002_v54 }
 0x1f6   : > { %v1050_v21 = vadd.f32 0.014752088, %v1049_v63  ;;  %v1014_v24 = vadd.f32 0.4994258, %v1013_v10  ;;  %v806_v34 = vmul.f32 %v805_v22, %v2504_v28  ;;  %v768_v42 = vmul.f32 %v767_v20, %v2472_v44 }
 0x1f7   : > { %v1040_v14 = vmul.f32 %v1039_v57, %v2495_v16  ;;  %v796_v17 = vadd.f32 0.0036580483, %v795_v60  ;;  %v760_v38 = vadd.f32 0.18741608, %v759_v9  ;;  %v1004_v18 = vmul.f32 %v1003_v23, %v2462_v36 }
 0x1f8   : > { %v1051_v33 = vmul.f32 %v1050_v21, %v2495_v16  ;;  %v1015_v41 = vmul.f32 %v1014_v24, %v2462_v36  ;;  %v807_v49 = vadd.f32 0.014752088, %v806_v34  ;;  %v769_v54 = vadd.f32 0.112945676, %v768_v42 }
 0x1f9   : > { %v1041_v29 = vadd.f32 0.05243302, %v1040_v14  ;;  %v797_v31 = vmul.f32 %v796_v17, %v2504_v28  ;;  %v934_v55 = vadd.f32 0.4994258, %v933_v25  ;;  %v924_v4 = vmul.f32 %v923_v47, %v2425_v3 }
 0x1fa   : > { %v1052_v48 = vadd.f32 0.112945676, %v1051_v33  ;;  %v2532_v51 = vadd.f32 1.0, %v1015_v41  ;;  %v808_v63 = vmul.f32 %v807_v49, %v2504_v28  ;;  %v969_v36 = vmul.f32 %v968_v46, %v2454_v30 }
 0x1fb   : > { %v1042_v43 = vmul.f32 %v1041_v29, %v2495_v16  ;;  %v798_v45 = vadd.f32 0.05243302, %v797_v31  ;;  %v761_v9 = vmul.f32 %v760_v38, %v2472_v44  ;;  %v770_v14 = vmul.f32 %v769_v54, %v2472_v44 }
 0x1fc   : > { %v1053_v60 = vmul.f32 %v1052_v48, %v2495_v16  ;;  %1981 = vrcp.f32 %v2532_v51  ;;  %v962_v17 = vmul.f32 %v961_v35, %v2454_v30  ;;  %v1005_v21 = vadd.f32 1.1283791, %v1004_v18 }
 0x1fd   : > { %v1043_v56 = vadd.f32 0.18741608, %v1042_v43  ;;  %v799_v57 = vmul.f32 %v798_v45, %v2504_v28  ;;  %v809_v22 = vadd.f32 0.112945676, %v808_v63  ;;  %v935_v23 = vmul.f32 %v934_v55, %v2425_v3 }
 0x1fe   : > { %v1054_v13 = vadd.f32 0.4994258, %v1053_v60  ;;  %v2547_v47 = vadd.f32 0.0036580483, %v715_v52  ;;  %v771_v20 = vadd.f32 0.4994258, %v770_v14  ;;  %vm1022_vm9 = vweird.f32 %v2532_v51 }
 0x1ff   : > { %v800_v10 = vadd.f32 0.18741608, %v799_v57  ;;  %v1044_v27 = vmul.f32 %v1043_v56, %v2495_v16  ;;  %v2551_v46 = vadd.f32 1.1283791, %v924_v4  ;;  %v810_v29 = vmul.f32 %v809_v22, %v2504_v28 }
 0x200   : > { %v1055_v24 = vmul.f32 %v1054_v13, %v2495_v16  ;;  %v2555_v31 = vadd.f32 1.0, %v935_v23  ;;  %v762_v33 = vadd.f32 1.1283791, %v761_v9  ;;  %v2558_v34 = vmul.f32 0.5, %v2468_v40 }
 0x201   : > { %v801_v25 = vmul.f32 %v800_v10, %v2504_v28  ;;  %v772_v52 = vmul.f32 %v771_v20, %v2472_v44  ;;  %v2563_v38 = vadd.f32 0.18741608, %v962_v17  ;;  %v1006_v16 = vmul.f32 %v1005_v21, %v2447_v26 }
 0x202   : > { %v2560_v3 = vadd.f32 1.0, %v1055_v24  ;;  %v1982_v35 = vpop.eup %1981  ;;  %v811_v41 = vadd.f32 0.4994258, %v810_v29  ;;  %1983 = vrcp.f32 %v2555_v31  ;;  %v1045_v42 = vadd.f32 1.1283791, %v1044_v27 }
 0x203   : > { %v1018_v43 = vmul.f32 %v1982_v35, %v2532_v51  ;;  %v1026_v45 = vand.u32 2147483647, %v2532_v51  ;;  %v802_v40 = vadd.f32 1.1283791, %v801_v25  ;;  %v1028_v48 = vand.u32 2147483648, %v2532_v51 }
 0x204   : > { %1985 = vrcp.f32 %v2560_v3  ;;  %v2571_v49 = vadd.f32 1.0, %v772_v52  ;;  %v970_v44 = vadd.f32 0.014752088, %v969_v36  ;;  %v2574_v18 = vmul.f32 %v762_v33, %v2459_v32 }
 0x205   : > { %v1019_v26 = vsub.f32 1.0, %v1018_v43  ;;  %v812_v54 = vmul.f32 %v811_v41, %v2504_v28  ;;  %v1066_v55 = vand.u32 2147483647, %v2560_v3  ;;  %v1068_v56 = vand.u32 2147483648, %v2560_v3 }
 0x206   : > { %1987 = vrcp.f32 %v2571_v49  ;;  %v684_v57 = vmul.f32 3.8918573e-05, %v2432_v11  ;;  %vm1023_vm10 = vweird.f32 %v1982_v35  ;;  %vm2582_vm11 = vcmp.eq.f32.partialorder %v1026_v45, 8.507059e+37 }
 0x207   : > { %v1020_v60 = vmul.f32 %v1982_v35, %v1019_v26  ;;  %v2586_v32 = vadd.f32 1.0, %v812_v54  ;;  %v1046_v28 = vmul.f32 %v1045_v42, %v2481_v53  ;;  %v2592_v36 = vmul.f32 %v802_v40, %v2490_v5  ;;  %vm1024_vm13 = vmor %vm1022_vm9, %vm1023_vm10 }
 0x208   : > { %v2588_v4 = vpop.eup %1983  ;;  %v1029_v9 = vor.u32 1.1754944e-38, %v1028_v48  ;;  %v971_v10 = vmul.f32 %v970_v44, %v2454_v30  ;;  %vm1062_vm12 = vweird.f32 %v2560_v3  ;;  %v783_v17 = vand.u32 2147483647, %v2571_v49 }
 0x209   : > { %v1021_v14 = vadd.f32 %v1982_v35, %v1020_v60  ;;  %1989 = vrcp.f32 %v2586_v32  ;;  %vm2601_vm14 = vcmp.eq.f32.partialorder %v1066_v55, 8.507059e+37  ;;  %v1069_v5 = vor.u32 1.1754944e-38, %v1068_v56 }
 0x20a   : > { %v1986_v13 = vpop.eup %1985  ;;  %v685_v22 = vadd.f32 0.001143296, %v684_v57  ;;  %v785_v27 = vand.u32 2147483648, %v2571_v49  ;;  %v938_v24 = vmul.f32 %v2588_v4, %v2555_v31  ;;  %v724_v20 = vmul.f32 3.8918573e-05, %v2466_v39 }
 0x20b   : > { %v1058_v21 = vmul.f32 %v1986_v13, %v2560_v3  ;;  %v1025_v23 = vsel %vm1024_vm13, %v1982_v35, %v1021_v14  ;;  %vm779_vm15 = vweird.f32 %v2571_v49  ;;  %v972_v33 = vadd.f32 0.112945676, %v971_v10 }
 0x20c   : > { %v1988_v25 = vpop.eup %1987  ;;  %v1030_v51 = vsel %vm2582_vm11, %v1029_v9, %v1025_v23  ;;  %vm1063_vm0 = vweird.f32 %v1986_v13  ;;  %vm2613_vm1 = vcmp.eq.f32.partialorder %v783_v17, 8.507059e+37  ;;  %v939_v43 = vsub.f32 1.0, %v938_v24 }
 0x20d   : > { %v1059_v29 = vsub.f32 1.0, %v1058_v21  ;;  %v1031_v52 = vmul.f32 %v1030_v51, %v1006_v16  ;;  %v775_v41 = vmul.f32 %v1988_v25, %v2571_v49  ;;  %v973_v45 = vmul.f32 %v972_v33, %v2454_v30  ;;  %vm1064_vm3 = vmor %vm1062_vm12, %vm1063_vm0 }
 0x20e   : > { %v686_v40 = vmul.f32 %v685_v22, %v2432_v11  ;;  %v786_v26 = vor.u32 1.1754944e-38, %v785_v27  ;;  %vm819_vm2 = vweird.f32 %v2586_v32  ;;  %v725_v54 = vadd.f32 0.001143296, %v724_v20 }
 0x20f   : > { %v1060_v42 = vmul.f32 %v1986_v13, %v1059_v29  ;;  %v1990_v48 = vpop.eup %1989  ;;  %v776_v44 = vsub.f32 1.0, %v775_v41  ;;  %v823_v56 = vand.u32 2147483647, %v2586_v32  ;;  %v825_v57 = vand.u32 2147483648, %v2586_v32 }
 0x210   : > { %v815_v55 = vmul.f32 %v1990_v48, %v2586_v32  ;;  %vm780_vm4 = vweird.f32 %v1988_v25  ;;  %vm942_vm5 = vweird.f32 %v2555_v31  ;;  %v974_v63 = vadd.f32 0.4994258, %v973_v45 }
 0x211   : > { %v1061_v16 = vadd.f32 %v1986_v13, %v1060_v42  ;;  %v777_v60 = vmul.f32 %v1988_v25, %v776_v44  ;;  %v687_v9 = vadd.f32 0.014752088, %v686_v40  ;;  %v1716_v10 = vclamps-f32 %v1031_v52, 1.0  ;;  %vm781_vm6 = vmor %vm779_vm15, %vm780_vm4 }
 0x212   : > { %v816_v17 = vsub.f32 1.0, %v815_v55  ;;  %v940_v21 = vmul.f32 %v2588_v4, %v939_v43  ;;  %v975_v27 = vmul.f32 %v974_v63, %v2454_v30  ;;  %v726_v3 = vmul.f32 %v725_v54, %v2466_v39 }
 0x213   : > { %v1065_v14 = vsel %vm1064_vm3, %v1986_v13, %v1061_v16  ;;  %v778_v23 = vadd.f32 %v1988_v25, %v777_v60  ;;  %vm820_vm7 = vweird.f32 %v1990_v48  ;;  %vm943_vm8 = vweird.f32 %v2588_v4 }
 0x214   : > { %v1070_v22 = vsel %vm2601_vm14, %v1069_v5, %v1065_v14  ;;  %v817_v20 = vmul.f32 %v1990_v48, %v816_v17  ;;  %v826_v51 = vor.u32 1.1754944e-38, %v825_v57  ;;  %v2635_v29 = vadd.f32 1.0, %v975_v27  ;;  %vm821_vm9 = vmor %vm819_vm2, %vm820_vm7 }
 0x215   : > { %v1071_v24 = vmul.f32 %v1070_v22, %v1046_v28  ;;  %v782_v13 = vsel %vm781_vm6, %v1988_v25, %v778_v23  ;;  %v688_v53 = vmul.f32 %v687_v9, %v2432_v11  ;;  %v1076_v33 = vadd.f32 1.0, %v1716_v10  ;;  %vm2656_vm11 = vmor %vm942_vm5, %vm943_vm8 }
 0x216   : > { %v787_v52 = vsel %vm2613_vm1, %v786_v26, %v782_v13  ;;  %v818_v41 = vadd.f32 %v1990_v48, %v817_v20  ;;  %v941_v49 = vadd.f32 %v2588_v4, %v940_v21  ;;  %1991 = vrcp.f32 %v2635_v29 }
 0x217   : > { %v1717_v5 = vclamps-f32 %v1071_v24, 1.0  ;;  %v788_v28 = vmul.f32 %v787_v52, %v2574_v18  ;;  %v727_v25 = vadd.f32 0.014752088, %v726_v3  ;;  %vm824_vm10 = vcmp.eq.f32.partialorder %v823_v56, 8.507059e+37 }
 0x218   : > { %v822_v43 = vsel %vm821_vm9, %v1990_v48, %v818_v41  ;;  %v948_v45 = vand.u32 2147483648, %v2555_v31  ;;  %v946_v35 = vand.u32 2147483647, %v2555_v31  ;;  %v689_v26 = vadd.f32 0.112945676, %v688_v53 }
 0x219   : > { %v1077_v42 = vadd.f32 1.0, %v1717_v5  ;;  %v1709_v40 = vclamps-f32 %v788_v28, 1.0  ;;  %v827_v44 = vsel %vm824_vm10, %v826_v51, %v822_v43  ;;  %v717_v18 = vmul.f32 %v2547_v47, %v2466_v39 }
 0x21a   : > { %v1080_v32 = vmul.f32 %v1076_v33, %v2492_v6  ;;  %v828_v16 = vmul.f32 %v827_v44, %v2592_v36  ;;  %v964_v55 = vmul.f32 %v2563_v38, %v2454_v30  ;;  %v945_v47 = vsel %vm2656_vm11, %v2588_v4, %v941_v49 }
 0x21b   : > { %v1081_v54 = vmul.f32 %v1077_v42, %v2558_v34  ;;  %v690_v6 = vmul.f32 %v689_v26, %v2432_v11  ;;  %v728_v34 = vmul.f32 %v727_v25, %v2466_v39  ;;  %v833_v57 = vadd.f32 1.0, %v1709_v40 }
 0x21c   : > { %v1710_v56 = vclamps-f32 %v828_v16, 1.0  ;;  %v949_v60 = vor.u32 1.1754944e-38, %v948_v45  ;;  %v1992_v31 = vpop.eup %1991  ;;  %v679_v63 = vmul.f32 %v2509_v37, %v2432_v11  ;;  %vm947_vm12 = vcmp.eq.f32.partialorder %v946_v35, 8.507059e+37 }
 0x21d   : > { %v1083_v36 = vpack.c.bf16 %v1081_v54, %v1080_v32  ;;  %v691_v9 = vadd.f32 0.4994258, %v690_v6  ;;  %v729_v10 = vadd.f32 0.112945676, %v728_v34  ;;  %v666_v30 = vmul.f32 0.5, %v2476_v50 }
 0x21e   : > { %v834_v38 = vadd.f32 1.0, %v1710_v56  ;;  %v950_v4 = vsel %vm947_vm12, %v949_v60, %v945_v47  ;;  %v978_v14 = vmul.f32 %v1992_v31, %v2635_v29  ;;  %v926_v17 = vmul.f32 %v2551_v46, %v2416_v61 }
 0x21f   : > { %1090 = vmatpush.bf16.msra.mxu3 %v1083_v36  ;;  %v718_v21 = vadd.f32 0.05243302, %v717_v18  ;;  %v692_v22 = vmul.f32 %v691_v9, %v2432_v11  ;;  %v730_v23 = vmul.f32 %v729_v10, %v2466_v39  ;;  %v965_v27 = vadd.f32 1.1283791, %v964_v55 }
 0x220   : > { %v837_v37 = vmul.f32 %v833_v57, %v2539_v58  ;;  %v838_v3 = vmul.f32 %v834_v38, %v666_v30  ;;  %v979_v24 = vsub.f32 1.0, %v978_v14  ;;  %v951_v20 = vmul.f32 %v950_v4, %v926_v17  ;;  %v505_v30 = vld [vmem:[%s2898_s5] sm:$0xf] }
 0x221   : > { %v988_v50 = vand.u32 2147483648, %v2635_v29  ;;  %v693_v13 = vadd.f32 1.0, %v692_v22  ;;  %v731_v51 = vadd.f32 0.4994258, %v730_v23  ;;  %vm983_vm13 = vweird.f32 %v1992_v31 }
 0x222   : > { %v840_v53 = vpack.c.bf16 %v838_v3, %v837_v37  ;;  %v980_v5 = vmul.f32 %v1992_v31, %v979_v24  ;;  %v986_v61 = vand.u32 2147483647, %v2635_v29  ;;  %vm982_vm14 = vweird.f32 %v2635_v29 }
 0x223   : > { %1993 = vrcp.f32 %v693_v13  ;;  %v732_v33 = vmul.f32 %v731_v51, %v2466_v39  ;;  %v680_v58 = vadd.f32 0.18741608, %v679_v63  ;;  %v719_v52 = vmul.f32 %v718_v21, %v2466_v39  ;;  %vm984_vm15 = vmor %vm982_vm14, %vm983_vm13 }
 0x224   : > { %851 = vmatpush.bf16.msra.mxu1 %v840_v53  ;;  %v981_v46 = vadd.f32 %v1992_v31, %v980_v5  ;;  %v1714_v41 = vclamps-f32 %v951_v20, 1.0  ;;  %v989_v28 = vor.u32 1.1754944e-38, %v988_v50  ;;  %v966_v49 = vmul.f32 %v965_v27, %v2438_v15 }
 0x225   : > { %vm987_vm0 = vcmp.eq.f32.partialorder %v986_v61, 8.507059e+37  ;;  %v733_v42 = vadd.f32 1.0, %v732_v33  ;;  %v681_v44 = vmul.f32 %v680_v58, %v2432_v11  ;;  %v720_v29 = vadd.f32 0.18741608, %v719_v52 }
 0x226   : > { %v985_v25 = vsel %vm984_vm15, %v1992_v31, %v981_v46  ;;  %v1074_v35 = vadd.f32 1.0, %v1714_v41  ;;  %v906_v32 = vmul.f32 0.5, %v2413_v59  ;;  %v907_v54 = vmul.f32 0.5, %v2429_v7  ;;  %v584_v46 = vpop.permute.xlu2 %583 }
 0x227   : > { %v990_v43 = vsel %vm987_vm0, %v989_v28, %v985_v25  ;;  %1995 = vrcp.f32 %v733_v42  ;;  %v682_v15 = vadd.f32 1.1283791, %v681_v44  ;;  %v721_v55 = vmul.f32 %v720_v29, %v2466_v39  ;;  %v1779_v29 = vld [vmem:[#allocation6 + $0x78] sm:$0xf0] }
 0x228   : > { %v991_v45 = vmul.f32 %v990_v43, %v966_v49  ;;  %v1078_v47 = vmul.f32 %v1074_v35, %v906_v32  ;;  %v705_v6 = vand.u32 2147483648, %v693_v13  ;;  %v703_v11 = vand.u32 2147483647, %v693_v13  ;;  %v1777_v35 = vld [vmem:[#allocation6 + $0x70] sm:$0xf] }
 0x229   : > { %v1994_v40 = vpop.eup %1993  ;;  %vm699_vm2 = vweird.f32 %v693_v13  ;;  %v683_v59 = vmul.f32 %v682_v15, %v2423_v2  ;;  %v722_v63 = vadd.f32 1.1283791, %v721_v55  ;;  %v745_v39 = vand.u32 2147483648, %v733_v42  ;;  %v1874_v32 = vld [vmem:[#allocation6 + $0x74] sm:$0xf0] }
 0x22a   : > { %v1715_v26 = vclamps-f32 %v991_v45, 1.0  ;;  %v695_v18 = vmul.f32 %v1994_v40, %v693_v13  ;;  %vm700_vm1 = vweird.f32 %v1994_v40  ;;  %v706_v7 = vor.u32 1.1754944e-38, %v705_v6  ;;  %v1769_v55 = vld [vmem:[#allocation6 + $0x60] sm:$0xf] }
 0x22b   : > { %vm701_vm3 = vmor %vm699_vm2, %vm700_vm1  ;;  %vm704_vm4 = vcmp.eq.f32.partialorder %v703_v11, 8.507059e+37  ;;  %vm841_vm5 = vcmask 261120   ;;  %v743_v14 = vand.u32 2147483647, %v733_v42  ;;  %vm739_vm7 = vweird.f32 %v733_v42  ;;  %v1763_v11 = vld [vmem:[#allocation6 + $0x58] sm:$0xf0] }
 0x22c   : > { %v1075_v16 = vadd.f32 1.0, %v1715_v26  ;;  %v696_v48 = vsub.f32 1.0, %v695_v18  ;;  %v746_v2 = vor.u32 1.1754944e-38, %v745_v39  ;;  %v723_v22 = vmul.f32 %v722_v63, %v2442_v19  ;;  %v1867_v63 = vld [vmem:[#allocation6 + $0x44] sm:$0xf] }
 0x22d   : > { %v1996_v34 = vpop.eup %1995  ;;  %vm744_vm9 = vcmp.eq.f32.partialorder %v743_v14, 8.507059e+37  ;;  %v663_v50 = vmul.f32 0.5, %v2418_v62  ;;  %v664_v13 = vmul.f32 0.5, %v2434_v12  ;;  %v1778_v15 = vor.u32 %v1874_v32, %v1777_v35  ;;  %v1868_v39 = vld [vmem:[#allocation6 + $0x44] sm:$0xf0] }
 0x22e   : > { %v1079_v36 = vmul.f32 %v1075_v16, %v907_v54  ;;  %v697_v56 = vmul.f32 %v1994_v40, %v696_v48  ;;  %v735_v57 = vmul.f32 %v1996_v34, %v733_v42  ;;  %vm740_vm6 = vweird.f32 %v1996_v34  ;;  %v1871_v16 = vld [vmem:[#allocation6 + $0x64] sm:$0xf]  ;;  %v1771_v48 = vld [vmem:[#allocation6 + $0x68] sm:$0xf0]  ;;  %v1972_v32 = vld [vmem:[%s2900_s7] ss:$0 sm:$0xff] }
 0x22f   : > { %vm741_vm8 = vmor %vm739_vm7, %vm740_vm6  ;;  %1237 = vmatpush.bf16.msrb.mxu0 %v1778_v15 }
 0x230   : > { %v1082_v60 = vpack.c.bf16 %v1079_v36, %v1078_v47  ;;  %v698_v31 = vadd.f32 %v1994_v40, %v697_v56  ;;  %v736_v9 = vsub.f32 1.0, %v735_v57  ;;  %v1872_v47 = vld [vmem:[#allocation6 + $0x64] sm:$0xf0]  ;;  %v1869_v56 = vld [vmem:[#allocation6 + $0x54] sm:$0xf] }
 0x231   : > { %v1770_v36 = vor.u32 %v1872_v47, %v1769_v55  ;;  %v1761_v57 = vld [vmem:[#allocation6 + $0x50] sm:$0xf] }
 0x232   : > { %1091 = vmatpush.bf16.msra.mxu3 %v1082_v60  ;;  %v702_v10 = vsel %vm701_vm3, %v1994_v40, %v698_v31  ;;  %v737_v4 = vmul.f32 %v1996_v34, %v736_v9  ;;  %v1870_v60 = vld [vmem:[#allocation6 + $0x54] sm:$0xf0]  ;;  %v1766_v31 = vor.u32 %v1869_v56, %v1763_v11 }
 0x233   : > { %v707_v38 = vsel %vm704_vm4, %v706_v7, %v702_v10  ;;  %1238 = vmatpush.bf16.msrb.mxu0 %v1770_v36  ;;  %v1755_v7 = vld [vmem:[#allocation6 + $0x48] sm:$0xf0]  ;;  %v1753_v10 = vld [vmem:[#allocation6 + $0x40] sm:$0xf] }
 0x234   : > { %v708_v17 = vmul.f32 %v707_v38, %v683_v59  ;;  %v738_v21 = vadd.f32 %v1996_v34, %v737_v4  ;;  %v1762_v59 = vor.u32 %v1870_v60, %v1761_v57  ;;  %v1758_v4 = vor.u32 %v1867_v63, %v1755_v7  ;;  %v554_v36 = vld [vmem:[%s2903_s10] sm:$0x3] }
 0x235   : > { %1718 = vmatmul.msk.bf16.vlgmr.msra.gmra.mxu3 %vm841_vm5, %v505_v30  ;;  %v1153_v56 = vperm.slane %v554_v36, 0  ;;  %v1154_v60 = vperm.slane %v554_v36, 1 }
 0x236   : > { %v1707_v23 = vclamps-f32 %v708_v17, 1.0  ;;  %v742_v27 = vsel %vm741_vm8, %v1996_v34, %v738_v21  ;;  %v1774_v34 = vor.u32 %v1871_v16, %v1771_v48  ;;  %v1754_v21 = vor.u32 %v1868_v39, %v1753_v10 }
 0x237   : > { %v747_v37 = vsel %vm744_vm9, %v746_v2, %v742_v27  ;;  %1239 = vmatpush.bf16.msrb.mxu0 %v1762_v59  ;;  %v1865_v2 = vld [vmem:[#allocation6 + $0x34] sm:$0xf]  ;;  %v1866_v27 = vld [vmem:[#allocation6 + $0x34] sm:$0xf0] }
 0x238   : > { %v748_v3 = vmul.f32 %v747_v37, %v723_v22  ;;  %v831_v20 = vadd.f32 1.0, %v1707_v23  ;;  %v1747_v22 = vld [vmem:[#allocation6 + $0x38] sm:$0xf0]  ;;  %v1745_v23 = vld [vmem:[#allocation6 + $0x30] sm:$0xf] }
 0x23a   : > { %v1708_v24 = vclamps-f32 %v748_v3, 1.0  ;;  %v835_v53 = vmul.f32 %v831_v20, %v663_v50  ;;  %v1750_v3 = vor.u32 %v1865_v2, %v1747_v22  ;;  %v1746_v20 = vor.u32 %v1866_v27, %v1745_v23  ;;  %v1863_v50 = vld [vmem:[#allocation6 + $0x24] sm:$0xf] }
 0x23b   : > { %1240 = vmatpush.bf16.msrb.mxu0 %v1754_v21 }
 0x23c   : > { %v832_v51 = vadd.f32 1.0, %v1708_v24 }
 0x23e   : > { %v836_v5 = vmul.f32 %v832_v51, %v664_v13  ;;  %v1737_v13 = vld [vmem:[#allocation6 + $0x20] sm:$0xf]  ;;  %v1864_v51 = vld [vmem:[#allocation6 + $0x24] sm:$0xf0] }
 0x23f   : > { %1241 = vmatpush.bf16.msrb.mxu0 %v1746_v20 }
 0x240   : > { %v839_v61 = vpack.c.bf16 %v836_v5, %v835_v53 }
 0x242   : > { %852 = vmatpush.bf16.msra.mxu1 %v839_v61 }
 0x245   : > { %1711 = vmatmul.msk.bf16.vlgmr.msra.gmra.mxu1 %vm841_vm5, %v505_v30 }
 0x2b8   : > { %v1093_v19 = vpop.f32.mrf.mxu3 }
 0x2b9   : > { %v1094_v33 = vadd.f32 %v1093_v19, %v584_v46  ;;  %v1738_v19 = vor.u32 %v1864_v51, %v1737_v13 }
 0x2bb   : > { %v1097_v58 = vadd.f32 %v1094_v33, %v2369_v0  ;;  %v1861_v33 = vld [vmem:[#allocation6 + $0x14] sm:$0xf]  ;;  %1242 = vmatpush.bf16.msrb.mxu0 %v1738_v19 }
 0x2bd   : > { %1103 = vadd.xlane.f32.xlu1 %v1097_v58 }
 0x2c0   : > { %v1095_v52 = vpop.f32.mrf.mxu3 }
 0x2c2   : > { %v854_v41 = vpop.f32.mrf.mxu1 }
 0x2c3   : > { %v855_v28 = vadd.f32 %v854_v41, %v584_v46  ;;  %v1729_v41 = vld [vmem:[#allocation6 + $0x10] sm:$0xf] }
 0x2c5   : > { %v858_v62 = vadd.f32 %v855_v28, %v2373_v1  ;;  %v1873_v1 = vld [vmem:[#allocation6 + $0x74] sm:$0xf]  ;;  %v1862_v28 = vld [vmem:[#allocation6 + $0x14] sm:$0xf0] }
 0x2c6   : > { %v1782_v18 = vor.u32 %v1873_v1, %v1779_v29  ;;  %v1860_v1 = vld [vmem:[#allocation6 + $0x4] sm:$0xf0] }
 0x2c7   : > { %1101 = vadd.xlane.f32.xlu2 %v858_v62 }
 0x2c8   : > { %1251 = vmatpush.bf16.msrb.mxu2 %v1782_v18 }
 0x2ca   : > { %v856_v12 = vpop.f32.mrf.mxu1 }
 0x2cc   : > { %1252 = vmatpush.bf16.msrb.mxu2 %v1774_v34 }
 0x2d0   : > { %1253 = vmatpush.bf16.msrb.mxu2 %v1766_v31 }
 0x2d4   : > { %1254 = vmatpush.bf16.msrb.mxu2 %v1758_v4 }
 0x2d8   : > { %1255 = vmatpush.bf16.msrb.mxu2 %v1750_v3 }
 0x330   : > { %v1104_v49 = vpop.xlane.xlu1 %1103 }
 0x331   : > { %v1106_v25 = vmul.f32 %v1104_v49, %v2376_v8 }
 0x333   : > { %v2698_v42 = vsub.f32 %v1097_v58, %v1106_v25  ;;  %v1731_v58 = vld [vmem:[#allocation6 + $0x18] sm:$0xf0]  ;;  %v1730_v25 = vor.u32 %v1862_v28, %v1729_v41 }
 0x334   : > { %v1734_v49 = vor.u32 %v1861_v33, %v1731_v58 }
 0x335   : > { %v1110_v43 = vmul.f32 %v2698_v42, %v2698_v42  ;;  %1243 = vmatpush.bf16.msrb.mxu0 %v1730_v25 }
 0x337   : > { %1113 = vadd.xlane.f32.xlu2 %v1110_v43  ;;  %v1859_v43 = vld [vmem:[#allocation6 + $0x4] sm:$0xf] }
 0x33a   : > { %v1102_v45 = vpop.xlane.xlu2 %1101 }
 0x33b   : > { %v1105_v0 = vmul.f32 %v1102_v45, %v2376_v8  ;;  %v1723_v45 = vld [vmem:[#allocation6 + $0x8] sm:$0xf0] }
 0x33d   : > { %v2703_v40 = vsub.f32 %v858_v62, %v1105_v0 }
 0x33f   : > { %v1109_v44 = vmul.f32 %v2703_v40, %v2703_v40 }
 0x341   : > { %1111 = vadd.xlane.f32.xlu0 %v1109_v44  ;;  %v1721_v44 = vld [vmem:[#allocation6] sm:$0xf] }
 0x342   : > { %v1722_v18 = vor.u32 %v1860_v1, %v1721_v44 }
 0x344   : > { %1244 = vmatpush.bf16.msrb.mxu0 %v1722_v18 }
 0x3aa   : > { %v1114_v26 = vpop.xlane.xlu2 %1113 }
 0x3ab   : > { %v1116_v54 = vmul.f32 %v1114_v26, %v2376_v8  ;;  %v1726_v26 = vor.u32 %v1859_v43, %v1723_v45 }
 0x3ad   : > { %v1118_v6 = vadd.f32 1e-05, %v1116_v54 }
 0x3af   : > { %1997 = vrsqrt.f32 %v1118_v6  ;;  %vm1135_vm11 = vweird.f32 %v1118_v6 }
 0x3b4   : > { %v1112_v9 = vpop.xlane.xlu0 %1111 }
 0x3b5   : > { %v1115_v30 = vmul.f32 %v1112_v9, %v2376_v8  ;;  %v1998_v38 = vpop.eup %1997  ;;  %v1739_v8 = vld [vmem:[#allocation6 + $0x28] sm:$0xf0] }
 0x3b6   : > { %v1130_v17 = vmul.f32 %v1998_v38, %v1118_v6  ;;  %vm1136_vm10 = vweird.f32 %v1998_v38  ;;  %v1742_v5 = vor.u32 %v1863_v50, %v1739_v8 }
 0x3b7   : > { %v1117_v14 = vadd.f32 1e-05, %v1115_v30  ;;  %vm1137_vm12 = vmor %vm1135_vm11, %vm1136_vm10 }
 0x3b8   : > { %v1131_v37 = vmul.f32 %v1998_v38, %v1130_v17  ;;  %1256 = vmatpush.bf16.msrb.mxu2 %v1742_v5 }
 0x3b9   : > { %1999 = vrsqrt.f32 %v1117_v14  ;;  %vm1125_vm14 = vweird.f32 %v1117_v14 }
 0x3ba   : > { %v1132_v24 = vmul.f32 0.5, %v1131_v37 }
 0x3bc   : > { %v1133_v53 = vsub.f32 1.5, %v1132_v24  ;;  %1257 = vmatpush.bf16.msrb.mxu2 %v1734_v49 }
 0x3be   : > { %v1134_v46 = vmul.f32 %v1998_v38, %v1133_v53 }
 0x3bf   : > { %v2000_v61 = vpop.eup %1999 }
 0x3c0   : > { %v1120_v52 = vmul.f32 %v2000_v61, %v1117_v14  ;;  %v1138_v12 = vsel %vm1137_vm12, %v1998_v38, %v1134_v46  ;;  %vm1126_vm13 = vweird.f32 %v2000_v61  ;;  %1258 = vmatpush.bf16.msrb.mxu2 %v1726_v26 }
 0x3c1   : > { %v1140_v29 = vmul.f32 %v1138_v12, %v2698_v42  ;;  %vm1127_vm15 = vmor %vm1125_vm14, %vm1126_vm13  ;;  %v1973_v42 = vld [vmem:[%s2901_s8] ss:$0 sm:$0xff] }
 0x3c2   : > { %v1121_v62 = vmul.f32 %v2000_v61, %v1120_v52 }
 0x3c3   : > { %v1145_v16 = vmul.f32 %v1972_v32, %v1140_v29 }
 0x3c4   : > { %v1122_v0 = vmul.f32 0.5, %v1121_v62 }
 0x3c5   : > { %v1150_v47 = vadd.f32 %v1973_v42, %v1145_v16 }
 0x3c6   : > { %v1123_v35 = vsub.f32 1.5, %v1122_v0 }
 0x3c8   : > { %v1124_v54 = vmul.f32 %v2000_v61, %v1123_v35 }
 0x3ca   : > { %v1128_v48 = vsel %vm1127_vm15, %v2000_v61, %v1124_v54 }
 0x3cb   : > { %v1139_v15 = vmul.f32 %v1128_v48, %v2703_v40 }
 0x3cd   : > { %v1144_v55 = vmul.f32 %v1972_v32, %v1139_v15  ;;  %v1882_v15 = vld [vmem:[#allocation8 + $0x38] sm:$0xff] }
 0x3ce   : > { %1542 = vmatpush.bf16.msrb.mxu1 %v1882_v15 }
 0x3cf   : > { %v1149_v6 = vadd.f32 %v1973_v42, %v1144_v55 }
 0x3d1   : > { %v1151_v34 = vpack.c.bf16 %v1150_v47, %v1149_v6 }
 0x3d3   : > { %1245 = vmatmul.bf16.vlgmr.msrb.gmra.mxu0 %v1151_v34  ;;  %1259 = vmatmul.bf16.vlgmr.msrb.gmra.mxu2 %v1151_v34 }
 0x450   : > { %v1246_v11 = vpop.f32.mrf.mxu0 }
 0x451   : > { %v2720_v57 = vadd.f32 %v1246_v11, %v1153_v56  ;;  %v1881_v11 = vld [vmem:[#allocation8 + $0x30] sm:$0xff] }
 0x452   : > { %1543 = vmatpush.bf16.msrb.mxu1 %v1881_v11 }
 0x453   : > { %v2723_v40 = vmul.f32 0.70710677, %v2720_v57 }
 0x455   : > { %v1273_v31 = vmul.f32 %v2723_v40, %v2723_v40 }
 0x456   : > { %v1260_v59 = vpop.f32.mrf.mxu2 }
 0x457   : > { %v2727_v63 = vmin.f32 %v1273_v31, 16.0  ;;  %v2729_v7 = vadd.f32 %v1260_v59, %v1154_v60 }
 0x458   : > { %v1248_v9 = vpop.f32.mrf.mxu0 }
 0x459   : > { %v1275_v10 = vmul.f32 2.1237322e-06, %v2727_v63  ;;  %v1286_v39 = vmul.f32 3.8918573e-05, %v2727_v63  ;;  %v2733_v30 = vadd.f32 %v1248_v9, %v1153_v56  ;;  %v2736_v38 = vmul.f32 0.70710677, %v2729_v7 }
 0x45a   : > { %v1890_v9 = vld [vmem:[#allocation8 + $0x78] sm:$0xff] }
 0x45b   : > { %v1287_v4 = vadd.f32 0.001143296, %v1286_v39  ;;  %v1276_v14 = vadd.f32 0.00028619796, %v1275_v10  ;;  %v1313_v17 = vmul.f32 %v2736_v38, %v2736_v38  ;;  %v2741_v21 = vmul.f32 0.70710677, %v2733_v30  ;;  %1556 = vmatpush.bf16.msrb.mxu3 %v1890_v9 }
 0x45d   : > { %v1288_v2 = vmul.f32 %v1287_v4, %v2727_v63  ;;  %v2744_v22 = vmin.f32 %v1313_v17, 16.0  ;;  %v1353_v23 = vmul.f32 %v2741_v21, %v2741_v21  ;;  %v1277_v24 = vmul.f32 %v1276_v14, %v2727_v63 }
 0x45e   : > { %v1262_v27 = vpop.f32.mrf.mxu2 }
 0x45f   : > { %v1289_v37 = vadd.f32 0.014752088, %v1288_v2  ;;  %v2748_v3 = vadd.f32 %v1262_v27, %v1154_v60  ;;  %v1326_v20 = vmul.f32 3.8918573e-05, %v2744_v22  ;;  %v2752_v50 = vmin.f32 %v1353_v23, 16.0  ;;  %v1880_v23 = vld [vmem:[#allocation8 + $0x28] sm:$0xff] }
 0x460   : > { %v1315_v51 = vmul.f32 2.1237322e-06, %v2744_v22  ;;  %v1278_v33 = vadd.f32 0.0036580483, %v1277_v24  ;;  %1544 = vmatpush.bf16.msrb.mxu1 %v1880_v23 }
 0x461   : > { %v1290_v8 = vmul.f32 %v1289_v37, %v2727_v63  ;;  %v2756_v13 = vmul.f32 0.70710677, %v2748_v3  ;;  %v1327_v53 = vadd.f32 0.001143296, %v1326_v20  ;;  %v1355_v5 = vmul.f32 2.1237322e-06, %v2752_v50 }
 0x462   : > { %v1366_v46 = vmul.f32 3.8918573e-05, %v2752_v50  ;;  %v1316_v12 = vadd.f32 0.00028619796, %v1315_v51  ;;  %v1279_v1 = vmul.f32 %v1278_v33, %v2727_v63  ;;  %v1889_v51 = vld [vmem:[#allocation8 + $0x70] sm:$0xff] }
 0x463   : > { %v1291_v61 = vadd.f32 0.112945676, %v1290_v8  ;;  %v1393_v19 = vmul.f32 %v2756_v13, %v2756_v13  ;;  %v1328_v58 = vmul.f32 %v1327_v53, %v2744_v22  ;;  %v1356_v41 = vadd.f32 0.00028619796, %v1355_v5  ;;  %1557 = vmatpush.bf16.msrb.mxu3 %v1889_v51 }
 0x464   : > { %v1367_v28 = vadd.f32 0.001143296, %v1366_v46  ;;  %v1317_v18 = vmul.f32 %v1316_v12, %v2744_v22  ;;  %v1280_v47 = vadd.f32 0.05243302, %v1279_v1 }
 0x465   : > { %v1292_v52 = vmul.f32 %v1291_v61, %v2727_v63  ;;  %v2765_v62 = vmin.f32 %v1393_v19, 16.0  ;;  %v1329_v49 = vadd.f32 0.014752088, %v1328_v58  ;;  %v1357_v35 = vmul.f32 %v1356_v41, %v2752_v50  ;;  %v1879_v58 = vld [vmem:[#allocation8 + $0x20] sm:$0xff] }
 0x466   : > { %v1368_v43 = vmul.f32 %v1367_v28, %v2752_v50  ;;  %v1318_v36 = vadd.f32 0.0036580483, %v1317_v18  ;;  %v1281_v10 = vmul.f32 %v1280_v47, %v2727_v63  ;;  %1545 = vmatpush.bf16.msrb.mxu1 %v1879_v58 }
 0x467   : > { %v1293_v25 = vadd.f32 0.4994258, %v1292_v52  ;;  %v1330_v45 = vmul.f32 %v1329_v49, %v2744_v22  ;;  %v1395_v0 = vmul.f32 2.1237322e-06, %v2765_v62  ;;  %v1406_v44 = vmul.f32 3.8918573e-05, %v2765_v62 }
 0x468   : > { %v1369_v26 = vadd.f32 0.014752088, %v1368_v43  ;;  %v1358_v6 = vadd.f32 0.0036580483, %v1357_v35  ;;  %v1319_v17 = vmul.f32 %v1318_v36, %v2744_v22  ;;  %v1282_v53 = vadd.f32 0.18741608, %v1281_v10 }
 0x469   : > { %v1294_v29 = vmul.f32 %v1293_v25, %v2727_v63  ;;  %v1331_v32 = vadd.f32 0.112945676, %v1330_v45  ;;  %v1407_v54 = vadd.f32 0.001143296, %v1406_v44  ;;  %v1396_v55 = vadd.f32 0.00028619796, %v1395_v0 }
 0x46a   : > { %v1370_v48 = vmul.f32 %v1369_v26, %v2752_v50  ;;  %v1359_v39 = vmul.f32 %v1358_v6, %v2752_v50  ;;  %v1320_v46 = vadd.f32 0.05243302, %v1319_v17  ;;  %v1888_v49 = vld [vmem:[#allocation8 + $0x68] sm:$0xff]  ;;  %v1283_v25 = vmul.f32 %v1282_v53, %v2727_v63  ;;  %v1878_v45 = vld [vmem:[#allocation8 + $0x18] sm:$0xff]  ;;  %v1885_v17 = vld [vmem:[#allocation8 + $0x50] sm:$0xff] }
 0x46b   : > { %v2775_v16 = vadd.f32 1.0, %v1294_v29  ;;  %v1332_v42 = vmul.f32 %v1331_v32, %v2744_v22  ;;  %v1408_v34 = vmul.f32 %v1407_v54, %v2765_v62  ;;  %v1397_v59 = vmul.f32 %v1396_v55, %v2765_v62  ;;  %1558 = vmatpush.bf16.msrb.mxu3 %v1888_v49  ;;  %v1887_v29 = vld [vmem:[#allocation8 + $0x60] sm:$0xff]  ;;  %1546 = vmatpush.bf16.msrb.mxu1 %v1878_v45  ;;  %v1886_v36 = vld [vmem:[#allocation8 + $0x58] sm:$0xff] }
 0x46c   : > { %v1371_v60 = vadd.f32 0.112945676, %v1370_v48  ;;  %v1360_v5 = vadd.f32 0.05243302, %v1359_v39  ;;  %v1321_v1 = vmul.f32 %v1320_v46, %v2744_v22  ;;  %v1284_v55 = vadd.f32 1.1283791, %v1283_v25 }
 0x46d   : > { %2001 = vrcp.f32 %v2775_v16  ;;  %v1333_v56 = vadd.f32 0.4994258, %v1332_v42  ;;  %v1409_v14 = vadd.f32 0.014752088, %v1408_v34  ;;  %v1398_v8 = vadd.f32 0.0036580483, %v1397_v59 }
 0x46e   : > { %v1372_v4 = vmul.f32 %v1371_v60, %v2752_v50  ;;  %v1361_v43 = vmul.f32 %v1360_v5, %v2752_v50  ;;  %v1307_v35 = vand.u32 2147483648, %v2775_v16  ;;  %vm1301_vm1 = vweird.f32 %v2775_v16  ;;  %v1877_v42 = vld [vmem:[#allocation8 + $0x10] sm:$0xff]  ;;  %v1876_v39 = vld [vmem:[#allocation8 + $0x8] sm:$0xff]  ;;  %v1875_v53 = vld [vmem:[#allocation8] sm:$0xff] }
 0x46f   : > { %v1334_v31 = vmul.f32 %v1333_v56, %v2744_v22  ;;  %v1410_v24 = vmul.f32 %v1409_v14, %v2765_v62  ;;  %v1399_v28 = vmul.f32 %v1398_v8, %v2765_v62  ;;  %v1305_v63 = vand.u32 2147483647, %v2775_v16  ;;  %1559 = vmatpush.bf16.msrb.mxu3 %v1887_v29  ;;  %1547 = vmatpush.bf16.msrb.mxu1 %v1877_v42  ;;  %v1884_v46 = vld [vmem:[#allocation8 + $0x48] sm:$0xff] }
 0x470   : > { %v1373_v37 = vadd.f32 0.4994258, %v1372_v4  ;;  %v1362_v15 = vadd.f32 0.18741608, %v1361_v43  ;;  %v1322_v6 = vadd.f32 0.18741608, %v1321_v1  ;;  %v1285_v4 = vmul.f32 %v1284_v55, %v2723_v40 }
 0x471   : > { %v2787_v2 = vadd.f32 1.0, %v1334_v31  ;;  %v1411_v33 = vadd.f32 0.112945676, %v1410_v24  ;;  %v1400_v18 = vadd.f32 0.05243302, %v1399_v28  ;;  %vm1306_vm3 = vcmp.eq.f32.partialorder %v1305_v63, 8.507059e+37 }
 0x472   : > { %v1374_v19 = vmul.f32 %v1373_v37, %v2752_v50  ;;  %v1363_v9 = vmul.f32 %v1362_v15, %v2752_v50  ;;  %v1323_v14 = vmul.f32 %v1322_v6, %v2744_v22  ;;  %v1265_v54 = vmul.f32 0.5, %v2720_v57 }
 0x473   : > { %v2002_v27 = vpop.eup %2001  ;;  %2003 = vrcp.f32 %v2787_v2  ;;  %v1412_v12 = vmul.f32 %v1411_v33, %v2765_v62  ;;  %v1401_v60 = vmul.f32 %v1400_v18, %v2765_v62  ;;  %vm1341_vm4 = vweird.f32 %v2787_v2  ;;  %1560 = vmatpush.bf16.msrb.mxu3 %v1886_v36  ;;  %1548 = vmatpush.bf16.msrb.mxu1 %v1876_v39 }
 0x474   : > { %v1297_v20 = vmul.f32 %v2002_v27, %v2775_v16  ;;  %v2793_v41 = vadd.f32 1.0, %v1374_v19  ;;  %vm1302_vm0 = vweird.f32 %v2002_v27  ;;  %v1308_v16 = vor.u32 1.1754944e-38, %v1307_v35 }
 0x475   : > { %v1413_v32 = vadd.f32 0.4994258, %v1412_v12  ;;  %vm2808_vm2 = vmor %vm1301_vm1, %vm1302_vm0  ;;  %v1345_v50 = vand.u32 2147483647, %v2787_v2  ;;  %v1347_v24 = vand.u32 2147483648, %v2787_v2 }
 0x476   : > { %v1298_v61 = vsub.f32 1.0, %v1297_v20  ;;  %2005 = vrcp.f32 %v2793_v41  ;;  %v1387_v40 = vand.u32 2147483648, %v2793_v41  ;;  %v1402_v20 = vadd.f32 0.18741608, %v1401_v60 }
 0x477   : > { %v1414_v34 = vmul.f32 %v1413_v32, %v2765_v62  ;;  %v1364_v22 = vadd.f32 1.1283791, %v1363_v9  ;;  %v1385_v51 = vand.u32 2147483647, %v2793_v41  ;;  %v1324_v5 = vadd.f32 1.1283791, %v1323_v14  ;;  %1561 = vmatpush.bf16.msrb.mxu3 %v1885_v17  ;;  %1549 = vmatpush.bf16.msrb.mxu1 %v1875_v53 }
 0x478   : > { %v1299_v52 = vmul.f32 %v2002_v27, %v1298_v61  ;;  %vm1346_vm8 = vcmp.eq.f32.partialorder %v1345_v50, 8.507059e+37  ;;  %vm1381_vm9 = vweird.f32 %v2793_v41  ;;  %v1348_v28 = vor.u32 1.1754944e-38, %v1347_v24  ;;  %v1571_v24 = vld [vmem:[%s2358_s17 + $0x8] sm:$0xff] }
 0x479   : > { %v2799_v0 = vpop.eup %2003  ;;  %v2817_v31 = vadd.f32 1.0, %v1414_v34  ;;  %v1403_v12 = vmul.f32 %v1402_v20, %v2765_v62  ;;  %v1365_v49 = vmul.f32 %v1364_v22, %v2741_v21  ;;  %vm1386_vm11 = vcmp.eq.f32.partialorder %v1385_v51, 8.507059e+37 }
 0x47a   : > { %v1300_v44 = vadd.f32 %v2002_v27, %v1299_v52  ;;  %v1337_v26 = vmul.f32 %v2799_v0, %v2787_v2  ;;  %vm1342_vm5 = vweird.f32 %v2799_v0  ;;  %v1388_v2 = vor.u32 1.1754944e-38, %v1387_v40 }
 0x47b   : > { %2007 = vrcp.f32 %v2817_v31  ;;  %vm2833_vm7 = vmor %vm1341_vm4, %vm1342_vm5  ;;  %1562 = vmatpush.bf16.msrb.mxu3 %v1884_v46  ;;  %v1425_v63 = vand.u32 2147483647, %v2817_v31  ;;  %v1427_v62 = vand.u32 2147483648, %v2817_v31  ;;  %vm1421_vm13 = vweird.f32 %v2817_v31 }
 0x47c   : > { %v1338_v48 = vsub.f32 1.0, %v1337_v26  ;;  %v1304_v47 = vsel %vm2808_vm2, %v2002_v27, %v1300_v44  ;;  %v2006_v11 = vpop.eup %2005  ;;  %v1883_v44 = vld [vmem:[#allocation8 + $0x40] sm:$0xff]  ;;  %v1404_v26 = vadd.f32 1.1283791, %v1403_v12  ;;  %v1266_v60 = vmul.f32 0.5, %v2729_v7 }
 0x47d   : > { %v1309_v59 = vsel %vm1306_vm3, %v1308_v16, %v1304_v47  ;;  %v1377_v10 = vmul.f32 %v2006_v11, %v2793_v41  ;;  %vm1382_vm6 = vweird.f32 %v2006_v11  ;;  %v1325_v41 = vmul.f32 %v1324_v5, %v2736_v38 }
 0x47e   : > { %v1339_v56 = vmul.f32 %v2799_v0, %v1338_v48  ;;  %v1310_v37 = vmul.f32 %v1309_v59, %v1285_v4  ;;  %vm1383_vm10 = vmor %vm1381_vm9, %vm1382_vm6  ;;  %v1267_v48 = vmul.f32 0.5, %v2733_v30  ;;  %v1405_v55 = vmul.f32 %v1404_v26, %v2756_v13  ;;  %v1974_v4 = vld [vmem:[%s2905_s12] ss:$0 sm:$0xff] }
 0x47f   : > { %v1378_v27 = vsub.f32 1.0, %v1377_v10  ;;  %1563 = vmatpush.bf16.msrb.mxu3 %v1883_v44  ;;  %v1428_v47 = vor.u32 1.1754944e-38, %v1427_v62  ;;  %vm1426_vm15 = vcmp.eq.f32.partialorder %v1425_v63, 8.507059e+37 }
 0x480   : > { %v1340_v23 = vadd.f32 %v2799_v0, %v1339_v56  ;;  %v1783_v52 = vclamps-f32 %v1310_v37, 1.0 }
 0x481   : > { %v1379_v8 = vmul.f32 %v2006_v11, %v1378_v27  ;;  %v2008_v58 = vpop.eup %2007 }
 0x482   : > { %v1344_v19 = vsel %vm2833_vm7, %v2799_v0, %v1340_v23  ;;  %v1417_v43 = vmul.f32 %v2008_v58, %v2817_v31  ;;  %v1433_v35 = vadd.f32 1.0, %v1783_v52  ;;  %vm1422_vm12 = vweird.f32 %v2008_v58  ;;  %v1570_v23 = vld [vmem:[%s2358_s17] sm:$0xff] }
 0x483   : > { %v1380_v33 = vadd.f32 %v2006_v11, %v1379_v8  ;;  %v1349_v45 = vsel %vm1346_vm8, %v1348_v28, %v1344_v19  ;;  %vm1423_vm14 = vmor %vm1421_vm13, %vm1422_vm12  ;;  %v1268_v31 = vmul.f32 0.5, %v2748_v3 }
 0x484   : > { %v1418_v29 = vsub.f32 1.0, %v1417_v43  ;;  %v1350_v21 = vmul.f32 %v1349_v45, %v1325_v41  ;;  %v1437_v38 = vmul.f32 %v1433_v35, %v1265_v54 }
 0x485   : > { %v1384_v25 = vsel %vm1383_vm10, %v2006_v11, %v1380_v33 }
 0x486   : > { %v1389_v0 = vsel %vm1386_vm11, %v1388_v2, %v1384_v25  ;;  %v1419_v32 = vmul.f32 %v2008_v58, %v1418_v29  ;;  %v1784_v6 = vclamps-f32 %v1350_v21, 1.0 }
 0x487   : > { %v1390_v1 = vmul.f32 %v1389_v0, %v1365_v49 }
 0x488   : > { %v1420_v42 = vadd.f32 %v2008_v58, %v1419_v32  ;;  %v1434_v11 = vadd.f32 1.0, %v1784_v6 }
 0x489   : > { %v1785_v18 = vclamps-f32 %v1390_v1, 1.0 }
 0x48a   : > { %v1424_v36 = vsel %vm1423_vm14, %v2008_v58, %v1420_v42  ;;  %v1438_v59 = vmul.f32 %v1434_v11, %v1266_v60 }
 0x48b   : > { %v1435_v15 = vadd.f32 1.0, %v1785_v18  ;;  %v1429_v16 = vsel %vm1426_vm15, %v1428_v47, %v1424_v36 }
 0x48c   : > { %v1430_v56 = vmul.f32 %v1429_v16, %v1405_v55 }
 0x48d   : > { %v1439_v34 = vmul.f32 %v1435_v15, %v1267_v48 }
 0x48e   : > { %v1786_v30 = vclamps-f32 %v1430_v56, 1.0 }
 0x48f   : > { %v1441_v57 = vpack.c.bf16 %v1439_v34, %v1437_v38 }
 0x490   : > { %v1436_v13 = vadd.f32 1.0, %v1786_v30 }
 0x491   : > { %1550 = vmatmul.bf16.vlgmr.msrb.gmra.mxu1 %v1441_v57 }
 0x492   : > { %v1440_v9 = vmul.f32 %v1436_v13, %v1268_v31 }
 0x494   : > { %v1442_v10 = vpack.c.bf16 %v1440_v9, %v1438_v59 }
 0x496   : > { %1564 = vmatmul.bf16.vlgmr.msrb.gmra.mxu3 %v1442_v10 }
 0x50e   : > { %v1551_v39 = vpop.f32.mrf.mxu1 }
 0x50f   : > { %v1552_v14 = vadd.f32 %v1974_v4, %v1551_v39 }
 0x516   : > { %v1553_v27 = vpop.f32.mrf.mxu1 }
 0x517   : > { %v1554_v3 = vadd.f32 %v1974_v4, %v1553_v27 }
 0x519   : > { %v1565_v17 = vpop.f32.mrf.mxu3 }
 0x51a   : > { %v1566_v50 = vadd.f32 %v1565_v17, %v1552_v14 }
 0x51c   : > { %v1572_v7 = vadd.f32 %v1570_v23, %v1566_v50 }
 0x51e   : > { %1574 = vst [vmem:[%s493_s15] sm:$0xff] %v1572_v7 }
 0x521   : > { %v1567_v37 = vpop.f32.mrf.mxu3 }
 0x522   : > { %v1568_v40 = vadd.f32 %v1567_v37, %v1554_v3 }
 0x524   : > { %v1573_v20 = vadd.f32 %v1571_v24, %v1568_v40 }
 0x526   : > { %1575 = vst [vmem:[%s493_s15 + $0x8] sm:$0xff] %v1573_v20 }
 0x527   : > { %2126 = shalt.err (!%p2123_p10)
}
 0x528   : > { %s2179_s24 = smov 128   ;;  %s2180_s16 = smov 8  }
 0x529   : > { %1902 = dma.vmem_to_hbm [thread:$0]  (%p2322_p3), %s1590_s21, 256, %s1592_s11, %s1577_s29, %s2179_s24, %s2179_s24, %s2180_s16  }
 0x52a PF: > { %s2942_s15 = sld [smem:[#allocation13_spill]]  ;;  %p1924_p11 = scmp.ge.s32.totalorder %s2169_s28, 2 }
 0x52c   : > { %p1916_p12 = pnand %p1924_p11, %p2286_p6 }
 0x52e   : > { %p1917_p13 = pneg %p1916_p12 }
 0x530   : > { %s1606_s22 = sand.u32 1, %s2942_s15  }
 0x531   : > { %s1607_s23 = scalar_lea.sflag [#allocation5], %s1606_s22 }
 0x532   : > { %2152 = dma.done.wait (%p1917_p13), %s1607_s23, 256  }
 0x533   : > { %2154 = vsyncadd (%p1917_p13), %s1607_s23, 4294967040  ;;  %s2944_s28 = sld [smem:[#allocation16_spill]]  ;;  %s2947_s25 = smov %s2161_s26 }
 0x534   : > { %s2945_s27 = sld [smem:[#allocation14_spill]] }
 0x535   : > { %s2946_s9 = sld [smem:[#allocation17_spill]] }
 0x539   : > { %p27_p0 = scmp.ge.s32.totalorder %s2944_s28, 6  }
 0x53a   : > { %s2948_s26 = smov %s2945_s27 }
 0x53b   : > { %s2949_s27 = smov %s2946_s9  ;;  %29 = sbr.rel (!%p27_p0) target bundleno = 9 (0x9), region = 125 }
 0x540   :  { %1613 = vsyncpa [#allocation4], 1 }
 0x541   :  { %1615 = vsyncpa [#allocation4 + $0x1], 1 }
 0x542   :  { %1616 = vsyncpa [#allocation7], 1 }
 0x543   :  { %1617 = vsyncpa [#allocation5], 1 }
 0x544   :  { %1619 = vsyncpa [#allocation5 + $0x1], 1 }

</bundles_post_ra>
